<compile_context>
chip_gen: v7x
topology: tpu7x:2x2x1
jax: 0.10.0
libtpu: 0.0.40
codegen_flags: <defaults>
</compile_context>

<pallas_src>
import jax
import jax.numpy as jnp
from jax import lax
from jax.experimental import pallas as pl
from jax.experimental.pallas import tpu as pltpu


# ----------------------------- Pallas kernel --------------------------------
def lstm_fc_kernel(x_ref,        # (T, D)      input sequence              (VMEM)
                   wih_ref,      # (D, 4H)     input->gates weights^T (pre-scaled)
                   whh_ref,      # (H, 4H)     hidden->gates weights^T (pre-scaled)
                   b_ref,        # (1, 4H)     (b_ih + b_hh), pre-scaled
                   ga_ref,       # (1, 4H)     affine scale per gate slot
                   gb_ref,       # (1, 4H)     affine offset per gate slot
                   fc1b_ref,     # (1, 2048)   fc_1 bias                   (VMEM)
                   fcb_ref,      # (1, H)      fc bias                     (VMEM)
                   fc1w_hbm,     # (H, 2048)   fc_1 weight^T               (HBM, pl.ANY)
                   fcw_hbm,      # (2048, H)   fc weight^T                 (HBM, pl.ANY)
                   out_ref,      # (1, H)      final output                (VMEM)
                   fc1w_vmem,    # (H, 2048)   VMEM scratch
                   fcw_vmem,     # (2048, H)   VMEM scratch
                   dma_sem):     # DMA sems (2,)
    T = x_ref.shape[0]
    H = out_ref.shape[1]

    # Kick off the big FC weight DMAs immediately (fc_1 first — needed first);
    # they complete while the serial recurrence runs.
    cp1 = pltpu.make_async_copy(fc1w_hbm, fc1w_vmem, dma_sem.at[0])
    cp2 = pltpu.make_async_copy(fcw_hbm, fcw_vmem, dma_sem.at[1])
    cp1.start()
    cp2.start()

    # Hoisted input projection + (pre-scaled) fused bias: one tile-aligned (T,4H)
    # matmul off the critical path of the recurrence.
    xw = (jnp.dot(x_ref[...], wih_ref[...],
                  preferred_element_type=jnp.float32)
          + b_ref[...])                                          # (T, 4H)

    # Hoist every loop-invariant load / extraction out of the serial region.
    whh = whh_ref[...]                                           # (H, 4H)
    gate_a = ga_ref[...]                                         # (1, 4H)
    gate_b = gb_ref[...]                                         # (1, 4H)
    xw_rows = [xw[t:t + 1, :] for t in range(T)]                 # sublane extracts

    # Recurrence: h, c live in vregs; fully unrolled (T is small & static) so the
    # scheduler can interleave MXU / EUP / VPU work across adjacent steps.
    h = jnp.zeros((1, H), jnp.float32)
    c = jnp.zeros((1, H), jnp.float32)
    for t in range(T):                                           # static unroll
        gates = xw_rows[t] + jnp.dot(h, whh,
                                     preferred_element_type=jnp.float32)  # (1, 4H)
        # Single EUP pass over the whole gates vreg: i/f/o pre-activations were
        # pre-scaled by 0.5, so sigmoid(z) = 0.5*tanh(0.5 z) + 0.5; the g slot
        # keeps scale 1 / offset 0 and comes out as tanh(z_g) directly.
        tall = jnp.tanh(gates)                                   # 1 EUP pass (1,4H)
        act = gate_a * tall + gate_b                             # 1 VPU affine
        # PyTorch gate order: i, f, g, o
        i = act[:, 0 * H:1 * H]
        f = act[:, 1 * H:2 * H]
        g = act[:, 2 * H:3 * H]
        o = act[:, 3 * H:4 * H]
        c = f * c + i * g
        h = o * jnp.tanh(c)

    # hn.view(-1) -> relu -> fc_1 -> relu -> fc
    # TODO(synk): dropout is identity here (inference semantics / dr_rate=0).
    hn = jnp.maximum(h, 0.0)                                     # (1, H)

    cp1.wait()                                                   # fc_1 weights ready
    z = jnp.dot(hn, fc1w_vmem[...],
                preferred_element_type=jnp.float32) + fc1b_ref[...]
    z = jnp.maximum(z, 0.0)                                      # (1, 2048)

    cp2.wait()                                                   # fc weights ready
    out = jnp.dot(z, fcw_vmem[...],
                  preferred_element_type=jnp.float32) + fcb_ref[...]
    out_ref[...] = out                                           # (1, H)


# ------------------------------ wrapper --------------------------------------
def lstm_forward(x, params):
    """x: (B=1, T, D) float32.  Returns (H,) float32, matching module.forward."""
    assert x.shape[0] == 1, "original module requires num_layers * batch == 1"
    x2d = x[0]                                                   # (T, D)
    H = params["w_hh"].shape[1]
    fc1_out = params["fc1_w"].shape[0]

    # Pre-scale the i/f/o gate columns by 0.5 (trace-time, free) so the kernel
    # only needs a single tanh per step.  PyTorch gate order: i, f, g, o.
    half = jnp.full((H,), 0.5, jnp.float32)
    one = jnp.ones((H,), jnp.float32)
    zero = jnp.zeros((H,), jnp.float32)
    scale = jnp.concatenate([half, half, one, half])             # (4H,)
    gate_a = jnp.concatenate([half, half, one, half])[None, :]   # (1, 4H)
    gate_b = jnp.concatenate([half, half, zero, half])[None, :]  # (1, 4H)

    wih_t = params["w_ih"].T * scale[None, :]                    # (D, 4H)
    whh_t = params["w_hh"].T * scale[None, :]                    # (H, 4H)
    b = ((params["b_ih"] + params["b_hh"]) * scale)[None, :]     # (1, 4H)

    fc1w_t = params["fc1_w"].T                                   # (H, 2048)
    fc1b = params["fc1_b"][None, :]                              # (1, 2048)
    fcw_t = params["fc_w"].T                                     # (2048, H)
    fcb = params["fc_b"][None, :]                                # (1, H)

    vmem = pl.BlockSpec(memory_space=pltpu.MemorySpace.VMEM)
    hbm = pl.BlockSpec(memory_space=pl.ANY)

    out = pl.pallas_call(
        lstm_fc_kernel,
        out_shape=jax.ShapeDtypeStruct((1, H), jnp.float32),
        in_specs=[vmem, vmem, vmem, vmem, vmem, vmem, vmem, vmem, hbm, hbm],
        out_specs=vmem,
        scratch_shapes=[
            pltpu.VMEM((H, fc1_out), jnp.float32),
            pltpu.VMEM((fc1_out, H), jnp.float32),
            pltpu.SemaphoreType.DMA((2,)),
        ],
    )(x2d, wih_t, whh_t, b, gate_a, gate_b, fc1b, fcb, fc1w_t, fcw_t)
    return out[0]                                                # (H,)


# ------------------------- pure-JAX reference ---------------------------------
def lstm_forward_ref(x, params):
    x2d = x[0]
    H = params["w_hh"].shape[1]
    wih_t, whh_t = params["w_ih"].T, params["w_hh"].T
    b = params["b_ih"] + params["b_hh"]

    def step(carry, x_t):
        h, c = carry
        gates = x_t @ wih_t + h @ whh_t + b
        i = jax.nn.sigmoid(gates[0 * H:1 * H])
        f = jax.nn.sigmoid(gates[1 * H:2 * H])
        g = jnp.tanh(gates[2 * H:3 * H])
        o = jax.nn.sigmoid(gates[3 * H:4 * H])
        c = f * c + i * g
        h = o * jnp.tanh(c)
        return (h, c), None

    (h, _), _ = lax.scan(step, (jnp.zeros((H,)), jnp.zeros((H,))), x2d)
    out = jnp.maximum(h, 0.0)
    out = jnp.maximum(out @ params["fc1_w"].T + params["fc1_b"], 0.0)
    return out @ params["fc_w"].T + params["fc_b"]


# ------------------------------- main -----------------------------------------
if __name__ == "__main__":
    # Module hyper-params (small, consistent with the forward's constraints).
    num_classes = 10        # unused by forward
    input_size = 16
    hidden_size = 32
    num_layers = 1          # hn.view(-1) -> fc_1(hidden_size) forces this
    seq_length = 8
    dr_rate = 0.0           # dropout disabled (deterministic inference)
    batch = 1
    fc1_out = 2048

    key = jax.random.PRNGKey(0)
    ks = jax.random.split(key, 10)
    H, D = hidden_size, input_size
    klstm = 1.0 / jnp.sqrt(H)
    kfc1 = 1.0 / jnp.sqrt(H)
    kfc = 1.0 / jnp.sqrt(fc1_out)

    params = {
        "w_ih": jax.random.uniform(ks[0], (4 * H, D), jnp.float32, -klstm, klstm),
        "w_hh": jax.random.uniform(ks[1], (4 * H, H), jnp.float32, -klstm, klstm),
        "b_ih": jax.random.uniform(ks[2], (4 * H,), jnp.float32, -klstm, klstm),
        "b_hh": jax.random.uniform(ks[3], (4 * H,), jnp.float32, -klstm, klstm),
        "fc1_w": jax.random.uniform(ks[4], (fc1_out, H), jnp.float32, -kfc1, kfc1),
        "fc1_b": jax.random.uniform(ks[5], (fc1_out,), jnp.float32, -kfc1, kfc1),
        "fc_w": jax.random.uniform(ks[6], (H, fc1_out), jnp.float32, -kfc, kfc),
        "fc_b": jax.random.uniform(ks[7], (H,), jnp.float32, -kfc, kfc),
    }

    x = jax.random.normal(ks[8], (batch, seq_length, input_size), jnp.float32)

    out = jax.block_until_ready(lstm_forward(x, params))
    ref = jax.block_until_ready(lstm_forward_ref(x, params))

    assert out.shape == (hidden_size,)
    assert jnp.allclose(out, ref, atol=1e-4, rtol=1e-4), (out, ref)
    print("KERNEL_OK")
</pallas_src>

<mosaic_0001>
module attributes {stable_mosaic.version = 11 : i64} {
  func.func @lstm_fc_kernel(%arg0: memref<8x16xf32, #tpu.memory_space<vmem>>, %arg1: memref<16x128xf32, #tpu.memory_space<vmem>>, %arg2: memref<32x128xf32, #tpu.memory_space<vmem>>, %arg3: memref<1x128xf32, #tpu.memory_space<vmem>>, %arg4: memref<1x128xf32, #tpu.memory_space<vmem>>, %arg5: memref<1x128xf32, #tpu.memory_space<vmem>>, %arg6: memref<1x2048xf32, #tpu.memory_space<vmem>>, %arg7: memref<1x32xf32, #tpu.memory_space<vmem>>, %arg8: memref<32x2048xf32, #tpu.memory_space<any>>, %arg9: memref<2048x32xf32, #tpu.memory_space<any>>, %arg10: memref<1x32xf32, #tpu.memory_space<vmem>>, %arg11: memref<32x2048xf32, #tpu.memory_space<vmem>>, %arg12: memref<2048x32xf32, #tpu.memory_space<vmem>>, %arg13: memref<2x!tpu.dma_semaphore, #tpu.memory_space<semaphore_mem>>) attributes {dimension_semantics = [], scalar_prefetch = 0 : i64, scratch_operands = 3 : i64, tpu.core_type = #tpu.core_type<tc>} {
    %c0_i32 = arith.constant 0 : i32
    %0 = tpu.memref_slice %arg13[%c0_i32] : memref<2x!tpu.dma_semaphore, #tpu.memory_space<semaphore_mem>> -> memref<1x!tpu.dma_semaphore, #tpu.memory_space<semaphore_mem>>
    %1 = tpu.memref_squeeze %0 : memref<1x!tpu.dma_semaphore, #tpu.memory_space<semaphore_mem>> -> memref<!tpu.dma_semaphore, #tpu.memory_space<semaphore_mem>>
    tpu.enqueue_dma source(%arg8 : memref<32x2048xf32, #tpu.memory_space<any>>) target(%arg11 : memref<32x2048xf32, #tpu.memory_space<vmem>>) target_semaphore(%1 : memref<!tpu.dma_semaphore, #tpu.memory_space<semaphore_mem>>)
    %c1_i32 = arith.constant 1 : i32
    %2 = tpu.memref_slice %arg13[%c1_i32] : memref<2x!tpu.dma_semaphore, #tpu.memory_space<semaphore_mem>> -> memref<1x!tpu.dma_semaphore, #tpu.memory_space<semaphore_mem>>
    %3 = tpu.memref_squeeze %2 : memref<1x!tpu.dma_semaphore, #tpu.memory_space<semaphore_mem>> -> memref<!tpu.dma_semaphore, #tpu.memory_space<semaphore_mem>>
    tpu.enqueue_dma source(%arg9 : memref<2048x32xf32, #tpu.memory_space<any>>) target(%arg12 : memref<2048x32xf32, #tpu.memory_space<vmem>>) target_semaphore(%3 : memref<!tpu.dma_semaphore, #tpu.memory_space<semaphore_mem>>)
    %c0 = arith.constant 0 : index
    %c0_0 = arith.constant 0 : index
    %4 = vector.load %arg0[%c0, %c0_0] : memref<8x16xf32, #tpu.memory_space<vmem>>, vector<8x16xf32>
    %c0_1 = arith.constant 0 : index
    %c0_2 = arith.constant 0 : index
    %5 = vector.load %arg1[%c0_1, %c0_2] : memref<16x128xf32, #tpu.memory_space<vmem>>, vector<16x128xf32>
    %cst = arith.constant dense<0.000000e+00> : vector<8x128xf32>
    %6 = tpu.matmul %4, %5, %cst {dimension_numbers = #tpu.dot_dimension_numbers<[1], [0], [0], [1], [0, 0, 1, 1], [], []>} : vector<8x16xf32>, vector<16x128xf32>, vector<8x128xf32> -> vector<8x128xf32>
    %c0_3 = arith.constant 0 : index
    %c0_4 = arith.constant 0 : index
    %7 = vector.load %arg3[%c0_3, %c0_4] : memref<1x128xf32, #tpu.memory_space<vmem>>, vector<1x128xf32>
    %8 = vector.broadcast %7 : vector<1x128xf32> to vector<8x128xf32>
    %9 = arith.addf %6, %8 : vector<8x128xf32>
    %c0_5 = arith.constant 0 : index
    %c0_6 = arith.constant 0 : index
    %10 = vector.load %arg2[%c0_5, %c0_6] : memref<32x128xf32, #tpu.memory_space<vmem>>, vector<32x128xf32>
    %c0_7 = arith.constant 0 : index
    %c0_8 = arith.constant 0 : index
    %11 = vector.load %arg4[%c0_7, %c0_8] : memref<1x128xf32, #tpu.memory_space<vmem>>, vector<1x128xf32>
    %c0_9 = arith.constant 0 : index
    %c0_10 = arith.constant 0 : index
    %12 = vector.load %arg5[%c0_9, %c0_10] : memref<1x128xf32, #tpu.memory_space<vmem>>, vector<1x128xf32>
    %13 = vector.extract_strided_slice %9 {offsets = [0, 0], sizes = [1, 128], strides = [1, 1]} : vector<8x128xf32> to vector<1x128xf32>
    %14 = vector.extract_strided_slice %9 {offsets = [1, 0], sizes = [1, 128], strides = [1, 1]} : vector<8x128xf32> to vector<1x128xf32>
    %15 = vector.extract_strided_slice %9 {offsets = [2, 0], sizes = [1, 128], strides = [1, 1]} : vector<8x128xf32> to vector<1x128xf32>
    %16 = vector.extract_strided_slice %9 {offsets = [3, 0], sizes = [1, 128], strides = [1, 1]} : vector<8x128xf32> to vector<1x128xf32>
    %17 = vector.extract_strided_slice %9 {offsets = [4, 0], sizes = [1, 128], strides = [1, 1]} : vector<8x128xf32> to vector<1x128xf32>
    %18 = vector.extract_strided_slice %9 {offsets = [5, 0], sizes = [1, 128], strides = [1, 1]} : vector<8x128xf32> to vector<1x128xf32>
    %19 = vector.extract_strided_slice %9 {offsets = [6, 0], sizes = [1, 128], strides = [1, 1]} : vector<8x128xf32> to vector<1x128xf32>
    %20 = vector.extract_strided_slice %9 {offsets = [7, 0], sizes = [1, 128], strides = [1, 1]} : vector<8x128xf32> to vector<1x128xf32>
    %cst_11 = arith.constant 0.000000e+00 : f32
    %21 = vector.broadcast %cst_11 : f32 to vector<1x32xf32>
    %cst_12 = arith.constant 0.000000e+00 : f32
    %22 = vector.broadcast %cst_12 : f32 to vector<1x32xf32>
    %cst_13 = arith.constant dense<0.000000e+00> : vector<1x128xf32>
    %23 = tpu.matmul %21, %10, %cst_13 {dimension_numbers = #tpu.dot_dimension_numbers<[1], [0], [0], [1], [0, 0, 1, 1], [], []>} : vector<1x32xf32>, vector<32x128xf32>, vector<1x128xf32> -> vector<1x128xf32>
    %24 = arith.addf %13, %23 : vector<1x128xf32>
    %25 = math.tanh %24 : vector<1x128xf32>
    %26 = arith.mulf %11, %25 : vector<1x128xf32>
    %27 = arith.addf %26, %12 : vector<1x128xf32>
    %28 = vector.extract_strided_slice %27 {offsets = [0, 0], sizes = [1, 32], strides = [1, 1]} : vector<1x128xf32> to vector<1x32xf32>
    %29 = vector.extract_strided_slice %27 {offsets = [0, 32], sizes = [1, 32], strides = [1, 1]} : vector<1x128xf32> to vector<1x32xf32>
    %30 = vector.extract_strided_slice %27 {offsets = [0, 64], sizes = [1, 32], strides = [1, 1]} : vector<1x128xf32> to vector<1x32xf32>
    %31 = vector.extract_strided_slice %27 {offsets = [0, 96], sizes = [1, 32], strides = [1, 1]} : vector<1x128xf32> to vector<1x32xf32>
    %32 = arith.mulf %29, %22 : vector<1x32xf32>
    %33 = arith.mulf %28, %30 : vector<1x32xf32>
    %34 = arith.addf %32, %33 : vector<1x32xf32>
    %35 = math.tanh %34 : vector<1x32xf32>
    %36 = arith.mulf %31, %35 : vector<1x32xf32>
    %cst_14 = arith.constant dense<0.000000e+00> : vector<1x128xf32>
    %37 = tpu.matmul %36, %10, %cst_14 {dimension_numbers = #tpu.dot_dimension_numbers<[1], [0], [0], [1], [0, 0, 1, 1], [], []>} : vector<1x32xf32>, vector<32x128xf32>, vector<1x128xf32> -> vector<1x128xf32>
    %38 = arith.addf %14, %37 : vector<1x128xf32>
    %39 = math.tanh %38 : vector<1x128xf32>
    %40 = arith.mulf %11, %39 : vector<1x128xf32>
    %41 = arith.addf %40, %12 : vector<1x128xf32>
    %42 = vector.extract_strided_slice %41 {offsets = [0, 0], sizes = [1, 32], strides = [1, 1]} : vector<1x128xf32> to vector<1x32xf32>
    %43 = vector.extract_strided_slice %41 {offsets = [0, 32], sizes = [1, 32], strides = [1, 1]} : vector<1x128xf32> to vector<1x32xf32>
    %44 = vector.extract_strided_slice %41 {offsets = [0, 64], sizes = [1, 32], strides = [1, 1]} : vector<1x128xf32> to vector<1x32xf32>
    %45 = vector.extract_strided_slice %41 {offsets = [0, 96], sizes = [1, 32], strides = [1, 1]} : vector<1x128xf32> to vector<1x32xf32>
    %46 = arith.mulf %43, %34 : vector<1x32xf32>
    %47 = arith.mulf %42, %44 : vector<1x32xf32>
    %48 = arith.addf %46, %47 : vector<1x32xf32>
    %49 = math.tanh %48 : vector<1x32xf32>
    %50 = arith.mulf %45, %49 : vector<1x32xf32>
    %cst_15 = arith.constant dense<0.000000e+00> : vector<1x128xf32>
    %51 = tpu.matmul %50, %10, %cst_15 {dimension_numbers = #tpu.dot_dimension_numbers<[1], [0], [0], [1], [0, 0, 1, 1], [], []>} : vector<1x32xf32>, vector<32x128xf32>, vector<1x128xf32> -> vector<1x128xf32>
    %52 = arith.addf %15, %51 : vector<1x128xf32>
    %53 = math.tanh %52 : vector<1x128xf32>
    %54 = arith.mulf %11, %53 : vector<1x128xf32>
    %55 = arith.addf %54, %12 : vector<1x128xf32>
    %56 = vector.extract_strided_slice %55 {offsets = [0, 0], sizes = [1, 32], strides = [1, 1]} : vector<1x128xf32> to vector<1x32xf32>
    %57 = vector.extract_strided_slice %55 {offsets = [0, 32], sizes = [1, 32], strides = [1, 1]} : vector<1x128xf32> to vector<1x32xf32>
    %58 = vector.extract_strided_slice %55 {offsets = [0, 64], sizes = [1, 32], strides = [1, 1]} : vector<1x128xf32> to vector<1x32xf32>
    %59 = vector.extract_strided_slice %55 {offsets = [0, 96], sizes = [1, 32], strides = [1, 1]} : vector<1x128xf32> to vector<1x32xf32>
    %60 = arith.mulf %57, %48 : vector<1x32xf32>
    %61 = arith.mulf %56, %58 : vector<1x32xf32>
    %62 = arith.addf %60, %61 : vector<1x32xf32>
    %63 = math.tanh %62 : vector<1x32xf32>
    %64 = arith.mulf %59, %63 : vector<1x32xf32>
    %cst_16 = arith.constant dense<0.000000e+00> : vector<1x128xf32>
    %65 = tpu.matmul %64, %10, %cst_16 {dimension_numbers = #tpu.dot_dimension_numbers<[1], [0], [0], [1], [0, 0, 1, 1], [], []>} : vector<1x32xf32>, vector<32x128xf32>, vector<1x128xf32> -> vector<1x128xf32>
    %66 = arith.addf %16, %65 : vector<1x128xf32>
    %67 = math.tanh %66 : vector<1x128xf32>
    %68 = arith.mulf %11, %67 : vector<1x128xf32>
    %69 = arith.addf %68, %12 : vector<1x128xf32>
    %70 = vector.extract_strided_slice %69 {offsets = [0, 0], sizes = [1, 32], strides = [1, 1]} : vector<1x128xf32> to vector<1x32xf32>
    %71 = vector.extract_strided_slice %69 {offsets = [0, 32], sizes = [1, 32], strides = [1, 1]} : vector<1x128xf32> to vector<1x32xf32>
    %72 = vector.extract_strided_slice %69 {offsets = [0, 64], sizes = [1, 32], strides = [1, 1]} : vector<1x128xf32> to vector<1x32xf32>
    %73 = vector.extract_strided_slice %69 {offsets = [0, 96], sizes = [1, 32], strides = [1, 1]} : vector<1x128xf32> to vector<1x32xf32>
    %74 = arith.mulf %71, %62 : vector<1x32xf32>
    %75 = arith.mulf %70, %72 : vector<1x32xf32>
    %76 = arith.addf %74, %75 : vector<1x32xf32>
    %77 = math.tanh %76 : vector<1x32xf32>
    %78 = arith.mulf %73, %77 : vector<1x32xf32>
    %cst_17 = arith.constant dense<0.000000e+00> : vector<1x128xf32>
    %79 = tpu.matmul %78, %10, %cst_17 {dimension_numbers = #tpu.dot_dimension_numbers<[1], [0], [0], [1], [0, 0, 1, 1], [], []>} : vector<1x32xf32>, vector<32x128xf32>, vector<1x128xf32> -> vector<1x128xf32>
    %80 = arith.addf %17, %79 : vector<1x128xf32>
    %81 = math.tanh %80 : vector<1x128xf32>
    %82 = arith.mulf %11, %81 : vector<1x128xf32>
    %83 = arith.addf %82, %12 : vector<1x128xf32>
    %84 = vector.extract_strided_slice %83 {offsets = [0, 0], sizes = [1, 32], strides = [1, 1]} : vector<1x128xf32> to vector<1x32xf32>
    %85 = vector.extract_strided_slice %83 {offsets = [0, 32], sizes = [1, 32], strides = [1, 1]} : vector<1x128xf32> to vector<1x32xf32>
    %86 = vector.extract_strided_slice %83 {offsets = [0, 64], sizes = [1, 32], strides = [1, 1]} : vector<1x128xf32> to vector<1x32xf32>
    %87 = vector.extract_strided_slice %83 {offsets = [0, 96], sizes = [1, 32], strides = [1, 1]} : vector<1x128xf32> to vector<1x32xf32>
    %88 = arith.mulf %85, %76 : vector<1x32xf32>
    %89 = arith.mulf %84, %86 : vector<1x32xf32>
    %90 = arith.addf %88, %89 : vector<1x32xf32>
    %91 = math.tanh %90 : vector<1x32xf32>
    %92 = arith.mulf %87, %91 : vector<1x32xf32>
    %cst_18 = arith.constant dense<0.000000e+00> : vector<1x128xf32>
    %93 = tpu.matmul %92, %10, %cst_18 {dimension_numbers = #tpu.dot_dimension_numbers<[1], [0], [0], [1], [0, 0, 1, 1], [], []>} : vector<1x32xf32>, vector<32x128xf32>, vector<1x128xf32> -> vector<1x128xf32>
    %94 = arith.addf %18, %93 : vector<1x128xf32>
    %95 = math.tanh %94 : vector<1x128xf32>
    %96 = arith.mulf %11, %95 : vector<1x128xf32>
    %97 = arith.addf %96, %12 : vector<1x128xf32>
    %98 = vector.extract_strided_slice %97 {offsets = [0, 0], sizes = [1, 32], strides = [1, 1]} : vector<1x128xf32> to vector<1x32xf32>
    %99 = vector.extract_strided_slice %97 {offsets = [0, 32], sizes = [1, 32], strides = [1, 1]} : vector<1x128xf32> to vector<1x32xf32>
    %100 = vector.extract_strided_slice %97 {offsets = [0, 64], sizes = [1, 32], strides = [1, 1]} : vector<1x128xf32> to vector<1x32xf32>
    %101 = vector.extract_strided_slice %97 {offsets = [0, 96], sizes = [1, 32], strides = [1, 1]} : vector<1x128xf32> to vector<1x32xf32>
    %102 = arith.mulf %99, %90 : vector<1x32xf32>
    %103 = arith.mulf %98, %100 : vector<1x32xf32>
    %104 = arith.addf %102, %103 : vector<1x32xf32>
    %105 = math.tanh %104 : vector<1x32xf32>
    %106 = arith.mulf %101, %105 : vector<1x32xf32>
    %cst_19 = arith.constant dense<0.000000e+00> : vector<1x128xf32>
    %107 = tpu.matmul %106, %10, %cst_19 {dimension_numbers = #tpu.dot_dimension_numbers<[1], [0], [0], [1], [0, 0, 1, 1], [], []>} : vector<1x32xf32>, vector<32x128xf32>, vector<1x128xf32> -> vector<1x128xf32>
    %108 = arith.addf %19, %107 : vector<1x128xf32>
    %109 = math.tanh %108 : vector<1x128xf32>
    %110 = arith.mulf %11, %109 : vector<1x128xf32>
    %111 = arith.addf %110, %12 : vector<1x128xf32>
    %112 = vector.extract_strided_slice %111 {offsets = [0, 0], sizes = [1, 32], strides = [1, 1]} : vector<1x128xf32> to vector<1x32xf32>
    %113 = vector.extract_strided_slice %111 {offsets = [0, 32], sizes = [1, 32], strides = [1, 1]} : vector<1x128xf32> to vector<1x32xf32>
    %114 = vector.extract_strided_slice %111 {offsets = [0, 64], sizes = [1, 32], strides = [1, 1]} : vector<1x128xf32> to vector<1x32xf32>
    %115 = vector.extract_strided_slice %111 {offsets = [0, 96], sizes = [1, 32], strides = [1, 1]} : vector<1x128xf32> to vector<1x32xf32>
    %116 = arith.mulf %113, %104 : vector<1x32xf32>
    %117 = arith.mulf %112, %114 : vector<1x32xf32>
    %118 = arith.addf %116, %117 : vector<1x32xf32>
    %119 = math.tanh %118 : vector<1x32xf32>
    %120 = arith.mulf %115, %119 : vector<1x32xf32>
    %cst_20 = arith.constant dense<0.000000e+00> : vector<1x128xf32>
    %121 = tpu.matmul %120, %10, %cst_20 {dimension_numbers = #tpu.dot_dimension_numbers<[1], [0], [0], [1], [0, 0, 1, 1], [], []>} : vector<1x32xf32>, vector<32x128xf32>, vector<1x128xf32> -> vector<1x128xf32>
    %122 = arith.addf %20, %121 : vector<1x128xf32>
    %123 = math.tanh %122 : vector<1x128xf32>
    %124 = arith.mulf %11, %123 : vector<1x128xf32>
    %125 = arith.addf %124, %12 : vector<1x128xf32>
    %126 = vector.extract_strided_slice %125 {offsets = [0, 0], sizes = [1, 32], strides = [1, 1]} : vector<1x128xf32> to vector<1x32xf32>
    %127 = vector.extract_strided_slice %125 {offsets = [0, 32], sizes = [1, 32], strides = [1, 1]} : vector<1x128xf32> to vector<1x32xf32>
    %128 = vector.extract_strided_slice %125 {offsets = [0, 64], sizes = [1, 32], strides = [1, 1]} : vector<1x128xf32> to vector<1x32xf32>
    %129 = vector.extract_strided_slice %125 {offsets = [0, 96], sizes = [1, 32], strides = [1, 1]} : vector<1x128xf32> to vector<1x32xf32>
    %130 = arith.mulf %127, %118 : vector<1x32xf32>
    %131 = arith.mulf %126, %128 : vector<1x32xf32>
    %132 = arith.addf %130, %131 : vector<1x32xf32>
    %133 = math.tanh %132 : vector<1x32xf32>
    %134 = arith.mulf %129, %133 : vector<1x32xf32>
    %cst_21 = arith.constant 0.000000e+00 : f32
    %135 = vector.broadcast %cst_21 : f32 to vector<1x32xf32>
    %136 = arith.maximumf %134, %135 : vector<1x32xf32>
    %c0_i32_22 = arith.constant 0 : i32
    %137 = tpu.memref_slice %arg13[%c0_i32_22] : memref<2x!tpu.dma_semaphore, #tpu.memory_space<semaphore_mem>> -> memref<1x!tpu.dma_semaphore, #tpu.memory_space<semaphore_mem>>
    %138 = tpu.memref_squeeze %137 : memref<1x!tpu.dma_semaphore, #tpu.memory_space<semaphore_mem>> -> memref<!tpu.dma_semaphore, #tpu.memory_space<semaphore_mem>>
    tpu.wait_dma2 semaphore(%138 : memref<!tpu.dma_semaphore, #tpu.memory_space<semaphore_mem>>) src(%arg8 : memref<32x2048xf32, #tpu.memory_space<any>>) dst(%arg11 : memref<32x2048xf32, #tpu.memory_space<vmem>>)
    %c0_23 = arith.constant 0 : index
    %c0_24 = arith.constant 0 : index
    %139 = vector.load %arg11[%c0_23, %c0_24] : memref<32x2048xf32, #tpu.memory_space<vmem>>, vector<32x2048xf32>
    %cst_25 = arith.constant dense<0.000000e+00> : vector<1x2048xf32>
    %140 = tpu.matmul %136, %139, %cst_25 {dimension_numbers = #tpu.dot_dimension_numbers<[1], [0], [0], [1], [0, 0, 1, 1], [], []>} : vector<1x32xf32>, vector<32x2048xf32>, vector<1x2048xf32> -> vector<1x2048xf32>
    %c0_26 = arith.constant 0 : index
    %c0_27 = arith.constant 0 : index
    %141 = vector.load %arg6[%c0_26, %c0_27] : memref<1x2048xf32, #tpu.memory_space<vmem>>, vector<1x2048xf32>
    %142 = arith.addf %140, %141 : vector<1x2048xf32>
    %cst_28 = arith.constant 0.000000e+00 : f32
    %143 = vector.broadcast %cst_28 : f32 to vector<1x2048xf32>
    %144 = arith.maximumf %142, %143 : vector<1x2048xf32>
    %c1_i32_29 = arith.constant 1 : i32
    %145 = tpu.memref_slice %arg13[%c1_i32_29] : memref<2x!tpu.dma_semaphore, #tpu.memory_space<semaphore_mem>> -> memref<1x!tpu.dma_semaphore, #tpu.memory_space<semaphore_mem>>
    %146 = tpu.memref_squeeze %145 : memref<1x!tpu.dma_semaphore, #tpu.memory_space<semaphore_mem>> -> memref<!tpu.dma_semaphore, #tpu.memory_space<semaphore_mem>>
    tpu.wait_dma2 semaphore(%146 : memref<!tpu.dma_semaphore, #tpu.memory_space<semaphore_mem>>) src(%arg9 : memref<2048x32xf32, #tpu.memory_space<any>>) dst(%arg12 : memref<2048x32xf32, #tpu.memory_space<vmem>>)
    %c0_30 = arith.constant 0 : index
    %c0_31 = arith.constant 0 : index
    %147 = vector.load %arg12[%c0_30, %c0_31] : memref<2048x32xf32, #tpu.memory_space<vmem>>, vector<2048x32xf32>
    %cst_32 = arith.constant dense<0.000000e+00> : vector<1x32xf32>
    %148 = tpu.matmul %144, %147, %cst_32 {dimension_numbers = #tpu.dot_dimension_numbers<[1], [0], [0], [1], [0, 0, 1, 1], [], []>} : vector<1x2048xf32>, vector<2048x32xf32>, vector<1x32xf32> -> vector<1x32xf32>
    %c0_33 = arith.constant 0 : index
    %c0_34 = arith.constant 0 : index
    %149 = vector.load %arg7[%c0_33, %c0_34] : memref<1x32xf32, #tpu.memory_space<vmem>>, vector<1x32xf32>
    %150 = arith.addf %148, %149 : vector<1x32xf32>
    %c0_35 = arith.constant 0 : index
    %c0_36 = arith.constant 0 : index
    %151 = vector.load %arg10[%c0_35, %c0_36] : memref<1x32xf32, #tpu.memory_space<vmem>>, vector<1x32xf32>
    tpu.vector_store %arg10[%c0_35, %c0_36], %150 {strides = array<i32>} : memref<1x32xf32, #tpu.memory_space<vmem>>, vector<1x32xf32>,
    return
  }
}

</mosaic_0001>

<bundles_post_ra>
// kernel: tpu_custom_call.1
= control target key start
LH: loop header
LB: loop body
LE: loop exit
PB: predicated region body
PF: predicated region fallthrough
CT: control target
= control target key end

     0   :  { %15 = vsyncpa [#allocation6], 0  ;;  %s6555_s0 = inlined_call_operand.vmem [shape: f32[8,16], index: 0, kind: input, shape index: {}]   ;;  %s6556_s1 = inlined_call_operand.vmem [shape: f32[16,128], index: 1, kind: input, shape index: {}]   ;;  %s6557_s2 = inlined_call_operand.vmem [shape: f32[32,128], index: 2, kind: input, shape index: {}]   ;;  %s6558_s3 = inlined_call_operand.vmem [shape: f32[1,128], index: 3, kind: input, shape index: {}]   ;;  %s6559_s4 = inlined_call_operand.vmem [shape: f32[1,128], index: 4, kind: input, shape index: {}]   ;;  %s6560_s5 = inlined_call_operand.vmem [shape: f32[1,128], index: 5, kind: input, shape index: {}]   ;;  %s6561_s6 = inlined_call_operand.vmem [shape: f32[1,2048], index: 6, kind: input, shape index: {}]   ;;  %s6562_s7 = inlined_call_operand.vmem [shape: f32[1,32], index: 7, kind: input, shape index: {}]   ;;  %s6563_s8 = inlined_call_operand.vmem [shape: f32[32,2048], index: 8, kind: input, shape index: {}]   ;;  %s6564_s9 = inlined_call_operand.vmem [shape: f32[2048,32], index: 9, kind: input, shape index: {}]   ;;  %s6565_s10 = inlined_call_operand.hbm [shape: f32[1,32], index: 10, kind: output, shape index: {}]  }
   0x1   :  { %v4334_v0 = vld [vmem:[%s6563_s8] sm:$0xff]  ;;  %v4339_v1 = vld [vmem:[%s6563_s8 + $0x8] sm:$0xff]  ;;  %v4344_v2 = vld [vmem:[%s6563_s8 + $0x10] sm:$0xff] }
   0x2   :  { %v4349_v3 = vld [vmem:[%s6563_s8 + $0x18] sm:$0xff]  ;;  %v4354_v4 = vld [vmem:[%s6563_s8 + $0x20] sm:$0xff]  ;;  %v4359_v5 = vld [vmem:[%s6563_s8 + $0x28] sm:$0xff] }
   0x3   :  { %v4364_v6 = vld [vmem:[%s6563_s8 + $0x30] sm:$0xff]  ;;  %v4369_v7 = vld [vmem:[%s6563_s8 + $0x38] sm:$0xff]  ;;  %v4374_v8 = vld [vmem:[%s6563_s8 + $0x40] sm:$0xff] }
   0x4   :  { %v4379_v9 = vld [vmem:[%s6563_s8 + $0x48] sm:$0xff]  ;;  %v4384_v10 = vld [vmem:[%s6563_s8 + $0x50] sm:$0xff]  ;;  %v4389_v11 = vld [vmem:[%s6563_s8 + $0x58] sm:$0xff] }
   0x5   :  { %v4394_v12 = vld [vmem:[%s6563_s8 + $0x60] sm:$0xff]  ;;  %v4399_v13 = vld [vmem:[%s6563_s8 + $0x68] sm:$0xff]  ;;  %v4404_v14 = vld [vmem:[%s6563_s8 + $0x70] sm:$0xff] }
   0x6   :  { %6572 = vst [vmem:[#allocation12_spill] sm:$0xff] %v4394_v12  ;;  %6573 = vst [vmem:[#allocation13_spill] sm:$0xff] %v4399_v13  ;;  %v4409_v15 = vld [vmem:[%s6563_s8 + $0x78] sm:$0xff]  ;;  %v4414_v16 = vld [vmem:[%s6563_s8 + $0x80] sm:$0xff] }
   0x7   :  { %6574 = vst [vmem:[#allocation14_spill] sm:$0xff] %v4404_v14  ;;  %6575 = vst [vmem:[#allocation15_spill] sm:$0xff] %v4409_v15  ;;  %v4419_v17 = vld [vmem:[%s6563_s8 + $0x88] sm:$0xff]  ;;  %v4424_v18 = vld [vmem:[%s6563_s8 + $0x90] sm:$0xff] }
   0x8   :  { %v4429_v19 = vld [vmem:[%s6563_s8 + $0x98] sm:$0xff]  ;;  %v4434_v20 = vld [vmem:[%s6563_s8 + $0xa0] sm:$0xff]  ;;  %v4439_v21 = vld [vmem:[%s6563_s8 + $0xa8] sm:$0xff] }
   0x9   :  { %v4444_v22 = vld [vmem:[%s6563_s8 + $0xb0] sm:$0xff]  ;;  %v4449_v23 = vld [vmem:[%s6563_s8 + $0xb8] sm:$0xff]  ;;  %v4454_v24 = vld [vmem:[%s6563_s8 + $0xc0] sm:$0xff] }
   0xa   :  { %v4459_v25 = vld [vmem:[%s6563_s8 + $0xc8] sm:$0xff]  ;;  %v4464_v26 = vld [vmem:[%s6563_s8 + $0xd0] sm:$0xff]  ;;  %v4469_v27 = vld [vmem:[%s6563_s8 + $0xd8] sm:$0xff] }
   0xb   :  { %v4474_v28 = vld [vmem:[%s6563_s8 + $0xe0] sm:$0xff]  ;;  %v4479_v29 = vld [vmem:[%s6563_s8 + $0xe8] sm:$0xff]  ;;  %v4484_v30 = vld [vmem:[%s6563_s8 + $0xf0] sm:$0xff] }
   0xc   :  { %6576 = vst [vmem:[#allocation16_spill] sm:$0xff] %v4474_v28  ;;  %6577 = vst [vmem:[#allocation17_spill] sm:$0xff] %v4479_v29  ;;  %v4489_v31 = vld [vmem:[%s6563_s8 + $0xf8] sm:$0xff]  ;;  %v4494_v32 = vld [vmem:[%s6563_s8 + $0x100] sm:$0xff] }
   0xd   :  { %6578 = vst [vmem:[#allocation18_spill] sm:$0xff] %v4484_v30  ;;  %6579 = vst [vmem:[#allocation19_spill] sm:$0xff] %v4489_v31  ;;  %v4499_v33 = vld [vmem:[%s6563_s8 + $0x108] sm:$0xff]  ;;  %v4504_v34 = vld [vmem:[%s6563_s8 + $0x110] sm:$0xff] }
   0xe   :  { %v4509_v35 = vld [vmem:[%s6563_s8 + $0x118] sm:$0xff]  ;;  %v4514_v36 = vld [vmem:[%s6563_s8 + $0x120] sm:$0xff]  ;;  %v4519_v37 = vld [vmem:[%s6563_s8 + $0x128] sm:$0xff] }
   0xf   :  { %v4524_v38 = vld [vmem:[%s6563_s8 + $0x130] sm:$0xff]  ;;  %v4529_v39 = vld [vmem:[%s6563_s8 + $0x138] sm:$0xff]  ;;  %v4534_v40 = vld [vmem:[%s6563_s8 + $0x140] sm:$0xff] }
  0x10   :  { %6580 = vst [vmem:[#allocation20_spill] sm:$0xff] %v4534_v40  ;;  %v4539_v41 = vld [vmem:[%s6563_s8 + $0x148] sm:$0xff]  ;;  %v4544_v42 = vld [vmem:[%s6563_s8 + $0x150] sm:$0xff]  ;;  %v4549_v43 = vld [vmem:[%s6563_s8 + $0x158] sm:$0xff] }
  0x11   :  { %6581 = vst [vmem:[#allocation21_spill] sm:$0xff] %v4544_v42  ;;  %6582 = vst [vmem:[#allocation22_spill] sm:$0xff] %v4549_v43  ;;  %v4554_v44 = vld [vmem:[%s6563_s8 + $0x160] sm:$0xff]  ;;  %v4559_v45 = vld [vmem:[%s6563_s8 + $0x168] sm:$0xff] }
  0x12   :  { %6583 = vst [vmem:[#allocation23_spill] sm:$0xff] %v4554_v44  ;;  %6584 = vst [vmem:[#allocation24_spill] sm:$0xff] %v4559_v45  ;;  %v4564_v46 = vld [vmem:[%s6563_s8 + $0x170] sm:$0xff]  ;;  %v4569_v47 = vld [vmem:[%s6563_s8 + $0x178] sm:$0xff] }
  0x13   :  { %6585 = vst [vmem:[#allocation25_spill] sm:$0xff] %v4564_v46  ;;  %6586 = vst [vmem:[#allocation26_spill] sm:$0xff] %v4569_v47  ;;  %v4574_v48 = vld [vmem:[%s6563_s8 + $0x180] sm:$0xff]  ;;  %v4579_v49 = vld [vmem:[%s6563_s8 + $0x188] sm:$0xff] }
  0x14   :  { %v4584_v50 = vld [vmem:[%s6563_s8 + $0x190] sm:$0xff]  ;;  %v4589_v51 = vld [vmem:[%s6563_s8 + $0x198] sm:$0xff]  ;;  %v4594_v52 = vld [vmem:[%s6563_s8 + $0x1a0] sm:$0xff] }
  0x15   :  { %v4599_v53 = vld [vmem:[%s6563_s8 + $0x1a8] sm:$0xff]  ;;  %v4604_v54 = vld [vmem:[%s6563_s8 + $0x1b0] sm:$0xff]  ;;  %v4609_v55 = vld [vmem:[%s6563_s8 + $0x1b8] sm:$0xff] }
  0x16   :  { %v4614_v56 = vld [vmem:[%s6563_s8 + $0x1c0] sm:$0xff]  ;;  %v4619_v57 = vld [vmem:[%s6563_s8 + $0x1c8] sm:$0xff]  ;;  %v4624_v58 = vld [vmem:[%s6563_s8 + $0x1d0] sm:$0xff] }
  0x17   :  { %6587 = vst [vmem:[#allocation27_spill] sm:$0xff] %v4614_v56  ;;  %6588 = vst [vmem:[#allocation28_spill] sm:$0xff] %v4619_v57  ;;  %v4629_v59 = vld [vmem:[%s6563_s8 + $0x1d8] sm:$0xff]  ;;  %v4634_v60 = vld [vmem:[%s6563_s8 + $0x1e0] sm:$0xff] }
  0x18   :  { %6589 = vst [vmem:[#allocation29_spill] sm:$0xff] %v4624_v58  ;;  %6590 = vst [vmem:[#allocation30_spill] sm:$0xff] %v4629_v59  ;;  %v4639_v61 = vld [vmem:[%s6563_s8 + $0x1e8] sm:$0xff]  ;;  %v4644_v62 = vld [vmem:[%s6563_s8 + $0x1f0] sm:$0xff] }
  0x19   :  { %6591 = vst [vmem:[#allocation31_spill] sm:$0xff] %v4634_v60  ;;  %6592 = vst [vmem:[#allocation32_spill] sm:$0xff] %v4639_v61  ;;  %v4649_v63 = vld [vmem:[%s6563_s8 + $0x1f8] sm:$0xff] }
  0x1a   :  { %6593 = vst [vmem:[#allocation33_spill] sm:$0xff] %v4644_v62  ;;  %6594 = vst [vmem:[#allocation34_spill] sm:$0xff] %v4649_v63 }
  0x1b   :  { %199 = vsyncadd [#allocation4], 8192  ;;  %v4654_v46 = vld [vmem:[%s6564_s9] sm:$0xff]  ;;  %v4659_v60 = vld [vmem:[%s6564_s9 + $0x8] sm:$0xff] }
  0x1c   :  { %6595 = vst [vmem:[#allocation35_spill] sm:$0xff] %v4654_v46  ;;  %6596 = vst [vmem:[#allocation36_spill] sm:$0xff] %v4659_v60  ;;  %v4664_v62 = vld [vmem:[%s6564_s9 + $0x10] sm:$0xff]  ;;  %v4669_v44 = vld [vmem:[%s6564_s9 + $0x18] sm:$0xff] }
  0x1d   :  { %6597 = vst [vmem:[#allocation37_spill] sm:$0xff] %v4664_v62  ;;  %6598 = vst [vmem:[#allocation38_spill] sm:$0xff] %v4669_v44  ;;  %v4674_v63 = vld [vmem:[%s6564_s9 + $0x20] sm:$0xff]  ;;  %v4679_v46 = vld [vmem:[%s6564_s9 + $0x28] sm:$0xff] }
  0x1e   :  { %6599 = vst [vmem:[#allocation39_spill] sm:$0xff] %v4674_v63  ;;  %6600 = vst [vmem:[#allocation40_spill] sm:$0xff] %v4679_v46  ;;  %v4684_v60 = vld [vmem:[%s6564_s9 + $0x30] sm:$0xff]  ;;  %v4689_v62 = vld [vmem:[%s6564_s9 + $0x38] sm:$0xff] }
  0x1f   :  { %6601 = vst [vmem:[#allocation41_spill] sm:$0xff] %v4684_v60  ;;  %6602 = vst [vmem:[#allocation42_spill] sm:$0xff] %v4689_v62  ;;  %v4694_v44 = vld [vmem:[%s6564_s9 + $0x40] sm:$0xff]  ;;  %v4699_v63 = vld [vmem:[%s6564_s9 + $0x48] sm:$0xff] }
  0x20   :  { %6603 = vst [vmem:[#allocation43_spill] sm:$0xff] %v4694_v44  ;;  %6604 = vst [vmem:[#allocation44_spill] sm:$0xff] %v4699_v63  ;;  %v4704_v46 = vld [vmem:[%s6564_s9 + $0x50] sm:$0xff]  ;;  %v4709_v60 = vld [vmem:[%s6564_s9 + $0x58] sm:$0xff] }
  0x21   :  { %6605 = vst [vmem:[#allocation45_spill] sm:$0xff] %v4704_v46  ;;  %6606 = vst [vmem:[#allocation46_spill] sm:$0xff] %v4709_v60  ;;  %v4714_v62 = vld [vmem:[%s6564_s9 + $0x60] sm:$0xff]  ;;  %v4719_v44 = vld [vmem:[%s6564_s9 + $0x68] sm:$0xff] }
  0x22   :  { %6607 = vst [vmem:[#allocation47_spill] sm:$0xff] %v4714_v62  ;;  %6608 = vst [vmem:[#allocation48_spill] sm:$0xff] %v4719_v44  ;;  %v4724_v63 = vld [vmem:[%s6564_s9 + $0x70] sm:$0xff]  ;;  %v4729_v46 = vld [vmem:[%s6564_s9 + $0x78] sm:$0xff] }
  0x23   :  { %6609 = vst [vmem:[#allocation49_spill] sm:$0xff] %v4724_v63  ;;  %6610 = vst [vmem:[#allocation50_spill] sm:$0xff] %v4729_v46  ;;  %v4734_v60 = vld [vmem:[%s6564_s9 + $0x80] sm:$0xff]  ;;  %v4739_v62 = vld [vmem:[%s6564_s9 + $0x88] sm:$0xff] }
  0x24   :  { %6611 = vst [vmem:[#allocation51_spill] sm:$0xff] %v4734_v60  ;;  %6612 = vst [vmem:[#allocation52_spill] sm:$0xff] %v4739_v62  ;;  %v4744_v44 = vld [vmem:[%s6564_s9 + $0x90] sm:$0xff]  ;;  %v4749_v63 = vld [vmem:[%s6564_s9 + $0x98] sm:$0xff] }
  0x25   :  { %6613 = vst [vmem:[#allocation53_spill] sm:$0xff] %v4744_v44  ;;  %6614 = vst [vmem:[#allocation54_spill] sm:$0xff] %v4749_v63  ;;  %v4754_v46 = vld [vmem:[%s6564_s9 + $0xa0] sm:$0xff]  ;;  %v4759_v60 = vld [vmem:[%s6564_s9 + $0xa8] sm:$0xff] }
  0x26   :  { %6615 = vst [vmem:[#allocation55_spill] sm:$0xff] %v4754_v46  ;;  %6616 = vst [vmem:[#allocation56_spill] sm:$0xff] %v4759_v60  ;;  %v4764_v62 = vld [vmem:[%s6564_s9 + $0xb0] sm:$0xff]  ;;  %v4769_v44 = vld [vmem:[%s6564_s9 + $0xb8] sm:$0xff] }
  0x27   :  { %6617 = vst [vmem:[#allocation57_spill] sm:$0xff] %v4764_v62  ;;  %6618 = vst [vmem:[#allocation58_spill] sm:$0xff] %v4769_v44  ;;  %v4774_v63 = vld [vmem:[%s6564_s9 + $0xc0] sm:$0xff]  ;;  %v4779_v46 = vld [vmem:[%s6564_s9 + $0xc8] sm:$0xff] }
  0x28   :  { %6619 = vst [vmem:[#allocation59_spill] sm:$0xff] %v4774_v63  ;;  %6620 = vst [vmem:[#allocation60_spill] sm:$0xff] %v4779_v46  ;;  %v4784_v60 = vld [vmem:[%s6564_s9 + $0xd0] sm:$0xff]  ;;  %v4789_v62 = vld [vmem:[%s6564_s9 + $0xd8] sm:$0xff] }
  0x29   :  { %6621 = vst [vmem:[#allocation61_spill] sm:$0xff] %v4784_v60  ;;  %6622 = vst [vmem:[#allocation62_spill] sm:$0xff] %v4789_v62  ;;  %v4794_v44 = vld [vmem:[%s6564_s9 + $0xe0] sm:$0xff]  ;;  %v4799_v63 = vld [vmem:[%s6564_s9 + $0xe8] sm:$0xff] }
  0x2a   :  { %6623 = vst [vmem:[#allocation63_spill] sm:$0xff] %v4794_v44  ;;  %6624 = vst [vmem:[#allocation64_spill] sm:$0xff] %v4799_v63  ;;  %v4804_v46 = vld [vmem:[%s6564_s9 + $0xf0] sm:$0xff]  ;;  %v4809_v60 = vld [vmem:[%s6564_s9 + $0xf8] sm:$0xff] }
  0x2b   :  { %6625 = vst [vmem:[#allocation65_spill] sm:$0xff] %v4804_v46  ;;  %6626 = vst [vmem:[#allocation66_spill] sm:$0xff] %v4809_v60  ;;  %v4814_v62 = vld [vmem:[%s6564_s9 + $0x100] sm:$0xff]  ;;  %v4819_v44 = vld [vmem:[%s6564_s9 + $0x108] sm:$0xff] }
  0x2c   :  { %6627 = vst [vmem:[#allocation67_spill] sm:$0xff] %v4814_v62  ;;  %6628 = vst [vmem:[#allocation68_spill] sm:$0xff] %v4819_v44  ;;  %v4824_v63 = vld [vmem:[%s6564_s9 + $0x110] sm:$0xff]  ;;  %v4829_v46 = vld [vmem:[%s6564_s9 + $0x118] sm:$0xff] }
  0x2d   :  { %6629 = vst [vmem:[#allocation69_spill] sm:$0xff] %v4824_v63  ;;  %6630 = vst [vmem:[#allocation70_spill] sm:$0xff] %v4829_v46  ;;  %v4834_v60 = vld [vmem:[%s6564_s9 + $0x120] sm:$0xff]  ;;  %v4839_v62 = vld [vmem:[%s6564_s9 + $0x128] sm:$0xff] }
  0x2e   :  { %6631 = vst [vmem:[#allocation71_spill] sm:$0xff] %v4834_v60  ;;  %6632 = vst [vmem:[#allocation72_spill] sm:$0xff] %v4839_v62  ;;  %v4844_v44 = vld [vmem:[%s6564_s9 + $0x130] sm:$0xff]  ;;  %v4849_v63 = vld [vmem:[%s6564_s9 + $0x138] sm:$0xff] }
  0x2f   :  { %6633 = vst [vmem:[#allocation73_spill] sm:$0xff] %v4844_v44  ;;  %6634 = vst [vmem:[#allocation74_spill] sm:$0xff] %v4849_v63  ;;  %v4854_v46 = vld [vmem:[%s6564_s9 + $0x140] sm:$0xff]  ;;  %v4859_v60 = vld [vmem:[%s6564_s9 + $0x148] sm:$0xff] }
  0x30   :  { %6635 = vst [vmem:[#allocation75_spill] sm:$0xff] %v4854_v46  ;;  %6636 = vst [vmem:[#allocation76_spill] sm:$0xff] %v4859_v60  ;;  %v4864_v62 = vld [vmem:[%s6564_s9 + $0x150] sm:$0xff]  ;;  %v4869_v44 = vld [vmem:[%s6564_s9 + $0x158] sm:$0xff] }
  0x31   :  { %6637 = vst [vmem:[#allocation77_spill] sm:$0xff] %v4864_v62  ;;  %6638 = vst [vmem:[#allocation78_spill] sm:$0xff] %v4869_v44  ;;  %v4874_v63 = vld [vmem:[%s6564_s9 + $0x160] sm:$0xff]  ;;  %v4879_v46 = vld [vmem:[%s6564_s9 + $0x168] sm:$0xff] }
  0x32   :  { %6639 = vst [vmem:[#allocation79_spill] sm:$0xff] %v4874_v63  ;;  %6640 = vst [vmem:[#allocation80_spill] sm:$0xff] %v4879_v46  ;;  %v4884_v60 = vld [vmem:[%s6564_s9 + $0x170] sm:$0xff]  ;;  %v4889_v62 = vld [vmem:[%s6564_s9 + $0x178] sm:$0xff] }
  0x33   :  { %6641 = vst [vmem:[#allocation81_spill] sm:$0xff] %v4884_v60  ;;  %6642 = vst [vmem:[#allocation82_spill] sm:$0xff] %v4889_v62  ;;  %v4894_v44 = vld [vmem:[%s6564_s9 + $0x180] sm:$0xff]  ;;  %v4899_v63 = vld [vmem:[%s6564_s9 + $0x188] sm:$0xff] }
  0x34   :  { %6643 = vst [vmem:[#allocation83_spill] sm:$0xff] %v4894_v44  ;;  %6644 = vst [vmem:[#allocation84_spill] sm:$0xff] %v4899_v63  ;;  %v4904_v46 = vld [vmem:[%s6564_s9 + $0x190] sm:$0xff]  ;;  %v4909_v60 = vld [vmem:[%s6564_s9 + $0x198] sm:$0xff] }
  0x35   :  { %6645 = vst [vmem:[#allocation85_spill] sm:$0xff] %v4904_v46  ;;  %6646 = vst [vmem:[#allocation86_spill] sm:$0xff] %v4909_v60  ;;  %v4914_v62 = vld [vmem:[%s6564_s9 + $0x1a0] sm:$0xff]  ;;  %v4919_v44 = vld [vmem:[%s6564_s9 + $0x1a8] sm:$0xff] }
  0x36   :  { %6647 = vst [vmem:[#allocation87_spill] sm:$0xff] %v4914_v62  ;;  %6648 = vst [vmem:[#allocation88_spill] sm:$0xff] %v4919_v44  ;;  %v4924_v63 = vld [vmem:[%s6564_s9 + $0x1b0] sm:$0xff]  ;;  %v4929_v46 = vld [vmem:[%s6564_s9 + $0x1b8] sm:$0xff] }
  0x37   :  { %6649 = vst [vmem:[#allocation89_spill] sm:$0xff] %v4924_v63  ;;  %6650 = vst [vmem:[#allocation90_spill] sm:$0xff] %v4929_v46  ;;  %v4934_v60 = vld [vmem:[%s6564_s9 + $0x1c0] sm:$0xff]  ;;  %v4939_v62 = vld [vmem:[%s6564_s9 + $0x1c8] sm:$0xff] }
  0x38   :  { %6651 = vst [vmem:[#allocation91_spill] sm:$0xff] %v4934_v60  ;;  %6652 = vst [vmem:[#allocation92_spill] sm:$0xff] %v4939_v62  ;;  %v4944_v44 = vld [vmem:[%s6564_s9 + $0x1d0] sm:$0xff]  ;;  %v4949_v63 = vld [vmem:[%s6564_s9 + $0x1d8] sm:$0xff] }
  0x39   :  { %6653 = vst [vmem:[#allocation93_spill] sm:$0xff] %v4944_v44  ;;  %6654 = vst [vmem:[#allocation94_spill] sm:$0xff] %v4949_v63  ;;  %v4954_v46 = vld [vmem:[%s6564_s9 + $0x1e0] sm:$0xff]  ;;  %v4959_v60 = vld [vmem:[%s6564_s9 + $0x1e8] sm:$0xff] }
  0x3a   :  { %6655 = vst [vmem:[#allocation95_spill] sm:$0xff] %v4954_v46  ;;  %6656 = vst [vmem:[#allocation96_spill] sm:$0xff] %v4959_v60  ;;  %v4964_v62 = vld [vmem:[%s6564_s9 + $0x1f0] sm:$0xff]  ;;  %v4969_v44 = vld [vmem:[%s6564_s9 + $0x1f8] sm:$0xff] }
  0x3b   :  { %6657 = vst [vmem:[#allocation97_spill] sm:$0xff] %v4964_v62  ;;  %6658 = vst [vmem:[#allocation98_spill] sm:$0xff] %v4969_v44  ;;  %v4974_v63 = vld [vmem:[%s6564_s9 + $0x200] sm:$0xff]  ;;  %v4979_v46 = vld [vmem:[%s6564_s9 + $0x208] sm:$0xff] }
  0x3c   :  { %6659 = vst [vmem:[#allocation99_spill] sm:$0xff] %v4974_v63  ;;  %6660 = vst [vmem:[#allocation100_spill] sm:$0xff] %v4979_v46  ;;  %v4984_v60 = vld [vmem:[%s6564_s9 + $0x210] sm:$0xff]  ;;  %v4989_v62 = vld [vmem:[%s6564_s9 + $0x218] sm:$0xff] }
  0x3d   :  { %6661 = vst [vmem:[#allocation101_spill] sm:$0xff] %v4984_v60  ;;  %6662 = vst [vmem:[#allocation102_spill] sm:$0xff] %v4989_v62  ;;  %v4994_v44 = vld [vmem:[%s6564_s9 + $0x220] sm:$0xff]  ;;  %v4999_v63 = vld [vmem:[%s6564_s9 + $0x228] sm:$0xff] }
  0x3e   :  { %6663 = vst [vmem:[#allocation103_spill] sm:$0xff] %v4994_v44  ;;  %6664 = vst [vmem:[#allocation104_spill] sm:$0xff] %v4999_v63  ;;  %v5004_v46 = vld [vmem:[%s6564_s9 + $0x230] sm:$0xff]  ;;  %v5009_v60 = vld [vmem:[%s6564_s9 + $0x238] sm:$0xff] }
  0x3f   :  { %6665 = vst [vmem:[#allocation105_spill] sm:$0xff] %v5004_v46  ;;  %6666 = vst [vmem:[#allocation106_spill] sm:$0xff] %v5009_v60  ;;  %v5014_v62 = vld [vmem:[%s6564_s9 + $0x240] sm:$0xff]  ;;  %v5019_v44 = vld [vmem:[%s6564_s9 + $0x248] sm:$0xff] }
  0x40   :  { %6667 = vst [vmem:[#allocation107_spill] sm:$0xff] %v5014_v62  ;;  %6668 = vst [vmem:[#allocation108_spill] sm:$0xff] %v5019_v44  ;;  %v5024_v63 = vld [vmem:[%s6564_s9 + $0x250] sm:$0xff]  ;;  %v5029_v46 = vld [vmem:[%s6564_s9 + $0x258] sm:$0xff] }
  0x41   :  { %6669 = vst [vmem:[#allocation109_spill] sm:$0xff] %v5024_v63  ;;  %6670 = vst [vmem:[#allocation110_spill] sm:$0xff] %v5029_v46  ;;  %v5034_v60 = vld [vmem:[%s6564_s9 + $0x260] sm:$0xff]  ;;  %v5039_v62 = vld [vmem:[%s6564_s9 + $0x268] sm:$0xff] }
  0x42   :  { %6671 = vst [vmem:[#allocation111_spill] sm:$0xff] %v5034_v60  ;;  %6672 = vst [vmem:[#allocation112_spill] sm:$0xff] %v5039_v62  ;;  %v5044_v44 = vld [vmem:[%s6564_s9 + $0x270] sm:$0xff]  ;;  %v5049_v63 = vld [vmem:[%s6564_s9 + $0x278] sm:$0xff] }
  0x43   :  { %6673 = vst [vmem:[#allocation113_spill] sm:$0xff] %v5044_v44  ;;  %6674 = vst [vmem:[#allocation114_spill] sm:$0xff] %v5049_v63  ;;  %v5054_v46 = vld [vmem:[%s6564_s9 + $0x280] sm:$0xff]  ;;  %v5059_v60 = vld [vmem:[%s6564_s9 + $0x288] sm:$0xff] }
  0x44   :  { %6675 = vst [vmem:[#allocation115_spill] sm:$0xff] %v5054_v46  ;;  %6676 = vst [vmem:[#allocation116_spill] sm:$0xff] %v5059_v60  ;;  %v5064_v62 = vld [vmem:[%s6564_s9 + $0x290] sm:$0xff]  ;;  %v5069_v44 = vld [vmem:[%s6564_s9 + $0x298] sm:$0xff] }
  0x45   :  { %6677 = vst [vmem:[#allocation117_spill] sm:$0xff] %v5064_v62  ;;  %6678 = vst [vmem:[#allocation118_spill] sm:$0xff] %v5069_v44  ;;  %v5074_v63 = vld [vmem:[%s6564_s9 + $0x2a0] sm:$0xff]  ;;  %v5079_v46 = vld [vmem:[%s6564_s9 + $0x2a8] sm:$0xff] }
  0x46   :  { %6679 = vst [vmem:[#allocation119_spill] sm:$0xff] %v5074_v63  ;;  %6680 = vst [vmem:[#allocation120_spill] sm:$0xff] %v5079_v46  ;;  %v5084_v60 = vld [vmem:[%s6564_s9 + $0x2b0] sm:$0xff]  ;;  %v5089_v62 = vld [vmem:[%s6564_s9 + $0x2b8] sm:$0xff] }
  0x47   :  { %6681 = vst [vmem:[#allocation121_spill] sm:$0xff] %v5084_v60  ;;  %6682 = vst [vmem:[#allocation122_spill] sm:$0xff] %v5089_v62  ;;  %v5094_v44 = vld [vmem:[%s6564_s9 + $0x2c0] sm:$0xff]  ;;  %v5099_v63 = vld [vmem:[%s6564_s9 + $0x2c8] sm:$0xff] }
  0x48   :  { %6683 = vst [vmem:[#allocation123_spill] sm:$0xff] %v5094_v44  ;;  %6684 = vst [vmem:[#allocation124_spill] sm:$0xff] %v5099_v63  ;;  %v5104_v46 = vld [vmem:[%s6564_s9 + $0x2d0] sm:$0xff]  ;;  %v5109_v60 = vld [vmem:[%s6564_s9 + $0x2d8] sm:$0xff] }
  0x49   :  { %6685 = vst [vmem:[#allocation125_spill] sm:$0xff] %v5104_v46  ;;  %6686 = vst [vmem:[#allocation126_spill] sm:$0xff] %v5109_v60  ;;  %v5114_v62 = vld [vmem:[%s6564_s9 + $0x2e0] sm:$0xff]  ;;  %v5119_v44 = vld [vmem:[%s6564_s9 + $0x2e8] sm:$0xff] }
  0x4a   :  { %6687 = vst [vmem:[#allocation127_spill] sm:$0xff] %v5114_v62  ;;  %6688 = vst [vmem:[#allocation128_spill] sm:$0xff] %v5119_v44  ;;  %v5124_v63 = vld [vmem:[%s6564_s9 + $0x2f0] sm:$0xff]  ;;  %v5129_v46 = vld [vmem:[%s6564_s9 + $0x2f8] sm:$0xff] }
  0x4b   :  { %6689 = vst [vmem:[#allocation129_spill] sm:$0xff] %v5124_v63  ;;  %6690 = vst [vmem:[#allocation130_spill] sm:$0xff] %v5129_v46  ;;  %v5134_v60 = vld [vmem:[%s6564_s9 + $0x300] sm:$0xff]  ;;  %v5139_v62 = vld [vmem:[%s6564_s9 + $0x308] sm:$0xff] }
  0x4c   :  { %6691 = vst [vmem:[#allocation131_spill] sm:$0xff] %v5134_v60  ;;  %6692 = vst [vmem:[#allocation132_spill] sm:$0xff] %v5139_v62  ;;  %v5144_v44 = vld [vmem:[%s6564_s9 + $0x310] sm:$0xff]  ;;  %v5149_v63 = vld [vmem:[%s6564_s9 + $0x318] sm:$0xff] }
  0x4d   :  { %6693 = vst [vmem:[#allocation133_spill] sm:$0xff] %v5144_v44  ;;  %6694 = vst [vmem:[#allocation134_spill] sm:$0xff] %v5149_v63  ;;  %v5154_v46 = vld [vmem:[%s6564_s9 + $0x320] sm:$0xff]  ;;  %v5159_v60 = vld [vmem:[%s6564_s9 + $0x328] sm:$0xff] }
  0x4e   :  { %6695 = vst [vmem:[#allocation135_spill] sm:$0xff] %v5154_v46  ;;  %6696 = vst [vmem:[#allocation136_spill] sm:$0xff] %v5159_v60  ;;  %v5164_v62 = vld [vmem:[%s6564_s9 + $0x330] sm:$0xff]  ;;  %v5169_v44 = vld [vmem:[%s6564_s9 + $0x338] sm:$0xff] }
  0x4f   :  { %6697 = vst [vmem:[#allocation137_spill] sm:$0xff] %v5164_v62  ;;  %6698 = vst [vmem:[#allocation138_spill] sm:$0xff] %v5169_v44  ;;  %v5174_v63 = vld [vmem:[%s6564_s9 + $0x340] sm:$0xff]  ;;  %v5179_v46 = vld [vmem:[%s6564_s9 + $0x348] sm:$0xff] }
  0x50   :  { %6699 = vst [vmem:[#allocation139_spill] sm:$0xff] %v5174_v63  ;;  %6700 = vst [vmem:[#allocation140_spill] sm:$0xff] %v5179_v46  ;;  %v5184_v60 = vld [vmem:[%s6564_s9 + $0x350] sm:$0xff]  ;;  %v5189_v62 = vld [vmem:[%s6564_s9 + $0x358] sm:$0xff] }
  0x51   :  { %6701 = vst [vmem:[#allocation141_spill] sm:$0xff] %v5184_v60  ;;  %6702 = vst [vmem:[#allocation142_spill] sm:$0xff] %v5189_v62  ;;  %v5194_v44 = vld [vmem:[%s6564_s9 + $0x360] sm:$0xff]  ;;  %v5199_v63 = vld [vmem:[%s6564_s9 + $0x368] sm:$0xff] }
  0x52   :  { %6703 = vst [vmem:[#allocation143_spill] sm:$0xff] %v5194_v44  ;;  %6704 = vst [vmem:[#allocation144_spill] sm:$0xff] %v5199_v63  ;;  %v5204_v46 = vld [vmem:[%s6564_s9 + $0x370] sm:$0xff]  ;;  %v5209_v60 = vld [vmem:[%s6564_s9 + $0x378] sm:$0xff] }
  0x53   :  { %6705 = vst [vmem:[#allocation145_spill] sm:$0xff] %v5204_v46  ;;  %6706 = vst [vmem:[#allocation146_spill] sm:$0xff] %v5209_v60  ;;  %v5214_v62 = vld [vmem:[%s6564_s9 + $0x380] sm:$0xff]  ;;  %v5219_v44 = vld [vmem:[%s6564_s9 + $0x388] sm:$0xff] }
  0x54   :  { %6707 = vst [vmem:[#allocation147_spill] sm:$0xff] %v5214_v62  ;;  %6708 = vst [vmem:[#allocation148_spill] sm:$0xff] %v5219_v44  ;;  %v5224_v63 = vld [vmem:[%s6564_s9 + $0x390] sm:$0xff]  ;;  %v5229_v46 = vld [vmem:[%s6564_s9 + $0x398] sm:$0xff] }
  0x55   :  { %6709 = vst [vmem:[#allocation149_spill] sm:$0xff] %v5224_v63  ;;  %6710 = vst [vmem:[#allocation150_spill] sm:$0xff] %v5229_v46  ;;  %v5234_v60 = vld [vmem:[%s6564_s9 + $0x3a0] sm:$0xff]  ;;  %v5239_v62 = vld [vmem:[%s6564_s9 + $0x3a8] sm:$0xff] }
  0x56   :  { %6711 = vst [vmem:[#allocation151_spill] sm:$0xff] %v5234_v60  ;;  %6712 = vst [vmem:[#allocation152_spill] sm:$0xff] %v5239_v62  ;;  %v5244_v44 = vld [vmem:[%s6564_s9 + $0x3b0] sm:$0xff]  ;;  %v5249_v63 = vld [vmem:[%s6564_s9 + $0x3b8] sm:$0xff] }
  0x57   :  { %6713 = vst [vmem:[#allocation153_spill] sm:$0xff] %v5244_v44  ;;  %6714 = vst [vmem:[#allocation154_spill] sm:$0xff] %v5249_v63  ;;  %v5254_v46 = vld [vmem:[%s6564_s9 + $0x3c0] sm:$0xff]  ;;  %v5259_v60 = vld [vmem:[%s6564_s9 + $0x3c8] sm:$0xff] }
  0x58   :  { %6715 = vst [vmem:[#allocation155_spill] sm:$0xff] %v5254_v46  ;;  %6716 = vst [vmem:[#allocation156_spill] sm:$0xff] %v5259_v60  ;;  %v5264_v62 = vld [vmem:[%s6564_s9 + $0x3d0] sm:$0xff]  ;;  %v5269_v44 = vld [vmem:[%s6564_s9 + $0x3d8] sm:$0xff] }
  0x59   :  { %6717 = vst [vmem:[#allocation157_spill] sm:$0xff] %v5264_v62  ;;  %6718 = vst [vmem:[#allocation158_spill] sm:$0xff] %v5269_v44  ;;  %v5274_v63 = vld [vmem:[%s6564_s9 + $0x3e0] sm:$0xff]  ;;  %v5279_v46 = vld [vmem:[%s6564_s9 + $0x3e8] sm:$0xff] }
  0x5a   :  { %6719 = vst [vmem:[#allocation159_spill] sm:$0xff] %v5274_v63  ;;  %6720 = vst [vmem:[#allocation160_spill] sm:$0xff] %v5279_v46  ;;  %v5284_v60 = vld [vmem:[%s6564_s9 + $0x3f0] sm:$0xff]  ;;  %v5289_v62 = vld [vmem:[%s6564_s9 + $0x3f8] sm:$0xff] }
  0x5b   :  { %6721 = vst [vmem:[#allocation161_spill] sm:$0xff] %v5284_v60  ;;  %6722 = vst [vmem:[#allocation162_spill] sm:$0xff] %v5289_v62  ;;  %v5294_v44 = vld [vmem:[%s6564_s9 + $0x400] sm:$0xff]  ;;  %v5299_v63 = vld [vmem:[%s6564_s9 + $0x408] sm:$0xff] }
  0x5c   :  { %6723 = vst [vmem:[#allocation163_spill] sm:$0xff] %v5294_v44  ;;  %6724 = vst [vmem:[#allocation164_spill] sm:$0xff] %v5299_v63  ;;  %v5304_v46 = vld [vmem:[%s6564_s9 + $0x410] sm:$0xff]  ;;  %v5309_v60 = vld [vmem:[%s6564_s9 + $0x418] sm:$0xff] }
  0x5d   :  { %6725 = vst [vmem:[#allocation165_spill] sm:$0xff] %v5304_v46  ;;  %6726 = vst [vmem:[#allocation166_spill] sm:$0xff] %v5309_v60  ;;  %v5314_v62 = vld [vmem:[%s6564_s9 + $0x420] sm:$0xff]  ;;  %v5319_v44 = vld [vmem:[%s6564_s9 + $0x428] sm:$0xff] }
  0x5e   :  { %6727 = vst [vmem:[#allocation167_spill] sm:$0xff] %v5314_v62  ;;  %6728 = vst [vmem:[#allocation168_spill] sm:$0xff] %v5319_v44  ;;  %v5324_v63 = vld [vmem:[%s6564_s9 + $0x430] sm:$0xff]  ;;  %v5329_v46 = vld [vmem:[%s6564_s9 + $0x438] sm:$0xff] }
  0x5f   :  { %6729 = vst [vmem:[#allocation169_spill] sm:$0xff] %v5324_v63  ;;  %6730 = vst [vmem:[#allocation170_spill] sm:$0xff] %v5329_v46  ;;  %v5334_v60 = vld [vmem:[%s6564_s9 + $0x440] sm:$0xff]  ;;  %v5339_v62 = vld [vmem:[%s6564_s9 + $0x448] sm:$0xff] }
  0x60   :  { %6731 = vst [vmem:[#allocation171_spill] sm:$0xff] %v5334_v60  ;;  %6732 = vst [vmem:[#allocation172_spill] sm:$0xff] %v5339_v62  ;;  %v5344_v44 = vld [vmem:[%s6564_s9 + $0x450] sm:$0xff]  ;;  %v5349_v63 = vld [vmem:[%s6564_s9 + $0x458] sm:$0xff] }
  0x61   :  { %6733 = vst [vmem:[#allocation173_spill] sm:$0xff] %v5344_v44  ;;  %6734 = vst [vmem:[#allocation174_spill] sm:$0xff] %v5349_v63  ;;  %v5354_v46 = vld [vmem:[%s6564_s9 + $0x460] sm:$0xff]  ;;  %v5359_v60 = vld [vmem:[%s6564_s9 + $0x468] sm:$0xff] }
  0x62   :  { %6735 = vst [vmem:[#allocation175_spill] sm:$0xff] %v5354_v46  ;;  %6736 = vst [vmem:[#allocation176_spill] sm:$0xff] %v5359_v60  ;;  %v5364_v62 = vld [vmem:[%s6564_s9 + $0x470] sm:$0xff]  ;;  %v5369_v44 = vld [vmem:[%s6564_s9 + $0x478] sm:$0xff] }
  0x63   :  { %6737 = vst [vmem:[#allocation177_spill] sm:$0xff] %v5364_v62  ;;  %6738 = vst [vmem:[#allocation178_spill] sm:$0xff] %v5369_v44  ;;  %v5374_v63 = vld [vmem:[%s6564_s9 + $0x480] sm:$0xff]  ;;  %v5379_v46 = vld [vmem:[%s6564_s9 + $0x488] sm:$0xff] }
  0x64   :  { %6739 = vst [vmem:[#allocation179_spill] sm:$0xff] %v5374_v63  ;;  %6740 = vst [vmem:[#allocation180_spill] sm:$0xff] %v5379_v46  ;;  %v5384_v60 = vld [vmem:[%s6564_s9 + $0x490] sm:$0xff]  ;;  %v5389_v62 = vld [vmem:[%s6564_s9 + $0x498] sm:$0xff] }
  0x65   :  { %6741 = vst [vmem:[#allocation181_spill] sm:$0xff] %v5384_v60  ;;  %6742 = vst [vmem:[#allocation182_spill] sm:$0xff] %v5389_v62  ;;  %v5394_v44 = vld [vmem:[%s6564_s9 + $0x4a0] sm:$0xff]  ;;  %v5399_v63 = vld [vmem:[%s6564_s9 + $0x4a8] sm:$0xff] }
  0x66   :  { %6743 = vst [vmem:[#allocation183_spill] sm:$0xff] %v5394_v44  ;;  %6744 = vst [vmem:[#allocation184_spill] sm:$0xff] %v5399_v63  ;;  %v5404_v46 = vld [vmem:[%s6564_s9 + $0x4b0] sm:$0xff]  ;;  %v5409_v60 = vld [vmem:[%s6564_s9 + $0x4b8] sm:$0xff] }
  0x67   :  { %6745 = vst [vmem:[#allocation185_spill] sm:$0xff] %v5404_v46  ;;  %6746 = vst [vmem:[#allocation186_spill] sm:$0xff] %v5409_v60  ;;  %v5414_v62 = vld [vmem:[%s6564_s9 + $0x4c0] sm:$0xff]  ;;  %v5419_v44 = vld [vmem:[%s6564_s9 + $0x4c8] sm:$0xff] }
  0x68   :  { %6747 = vst [vmem:[#allocation187_spill] sm:$0xff] %v5414_v62  ;;  %6748 = vst [vmem:[#allocation188_spill] sm:$0xff] %v5419_v44  ;;  %v5424_v63 = vld [vmem:[%s6564_s9 + $0x4d0] sm:$0xff]  ;;  %v5429_v46 = vld [vmem:[%s6564_s9 + $0x4d8] sm:$0xff] }
  0x69   :  { %6749 = vst [vmem:[#allocation189_spill] sm:$0xff] %v5424_v63  ;;  %6750 = vst [vmem:[#allocation190_spill] sm:$0xff] %v5429_v46  ;;  %v5434_v60 = vld [vmem:[%s6564_s9 + $0x4e0] sm:$0xff]  ;;  %v5439_v62 = vld [vmem:[%s6564_s9 + $0x4e8] sm:$0xff] }
  0x6a   :  { %6751 = vst [vmem:[#allocation191_spill] sm:$0xff] %v5434_v60  ;;  %6752 = vst [vmem:[#allocation192_spill] sm:$0xff] %v5439_v62  ;;  %v5444_v44 = vld [vmem:[%s6564_s9 + $0x4f0] sm:$0xff]  ;;  %v5449_v63 = vld [vmem:[%s6564_s9 + $0x4f8] sm:$0xff] }
  0x6b   :  { %6753 = vst [vmem:[#allocation193_spill] sm:$0xff] %v5444_v44  ;;  %6754 = vst [vmem:[#allocation194_spill] sm:$0xff] %v5449_v63  ;;  %v5454_v46 = vld [vmem:[%s6564_s9 + $0x500] sm:$0xff]  ;;  %v5459_v60 = vld [vmem:[%s6564_s9 + $0x508] sm:$0xff] }
  0x6c   :  { %6755 = vst [vmem:[#allocation195_spill] sm:$0xff] %v5454_v46  ;;  %6756 = vst [vmem:[#allocation196_spill] sm:$0xff] %v5459_v60  ;;  %v5464_v62 = vld [vmem:[%s6564_s9 + $0x510] sm:$0xff]  ;;  %v5469_v44 = vld [vmem:[%s6564_s9 + $0x518] sm:$0xff] }
  0x6d   :  { %6757 = vst [vmem:[#allocation197_spill] sm:$0xff] %v5464_v62  ;;  %6758 = vst [vmem:[#allocation198_spill] sm:$0xff] %v5469_v44  ;;  %v5474_v63 = vld [vmem:[%s6564_s9 + $0x520] sm:$0xff]  ;;  %v5479_v46 = vld [vmem:[%s6564_s9 + $0x528] sm:$0xff] }
  0x6e   :  { %6759 = vst [vmem:[#allocation199_spill] sm:$0xff] %v5474_v63  ;;  %6760 = vst [vmem:[#allocation200_spill] sm:$0xff] %v5479_v46  ;;  %v5484_v60 = vld [vmem:[%s6564_s9 + $0x530] sm:$0xff]  ;;  %v5489_v62 = vld [vmem:[%s6564_s9 + $0x538] sm:$0xff] }
  0x6f   :  { %6761 = vst [vmem:[#allocation201_spill] sm:$0xff] %v5484_v60  ;;  %6762 = vst [vmem:[#allocation202_spill] sm:$0xff] %v5489_v62  ;;  %v5494_v44 = vld [vmem:[%s6564_s9 + $0x540] sm:$0xff]  ;;  %v5499_v63 = vld [vmem:[%s6564_s9 + $0x548] sm:$0xff] }
  0x70   :  { %6763 = vst [vmem:[#allocation203_spill] sm:$0xff] %v5494_v44  ;;  %6764 = vst [vmem:[#allocation204_spill] sm:$0xff] %v5499_v63  ;;  %v5504_v46 = vld [vmem:[%s6564_s9 + $0x550] sm:$0xff]  ;;  %v5509_v60 = vld [vmem:[%s6564_s9 + $0x558] sm:$0xff] }
  0x71   :  { %6765 = vst [vmem:[#allocation205_spill] sm:$0xff] %v5504_v46  ;;  %6766 = vst [vmem:[#allocation206_spill] sm:$0xff] %v5509_v60  ;;  %v5514_v62 = vld [vmem:[%s6564_s9 + $0x560] sm:$0xff]  ;;  %v5519_v44 = vld [vmem:[%s6564_s9 + $0x568] sm:$0xff] }
  0x72   :  { %6767 = vst [vmem:[#allocation207_spill] sm:$0xff] %v5514_v62  ;;  %6768 = vst [vmem:[#allocation208_spill] sm:$0xff] %v5519_v44  ;;  %v5524_v63 = vld [vmem:[%s6564_s9 + $0x570] sm:$0xff]  ;;  %v5529_v46 = vld [vmem:[%s6564_s9 + $0x578] sm:$0xff] }
  0x73   :  { %6769 = vst [vmem:[#allocation209_spill] sm:$0xff] %v5524_v63  ;;  %6770 = vst [vmem:[#allocation210_spill] sm:$0xff] %v5529_v46  ;;  %v5534_v60 = vld [vmem:[%s6564_s9 + $0x580] sm:$0xff]  ;;  %v5539_v62 = vld [vmem:[%s6564_s9 + $0x588] sm:$0xff] }
  0x74   :  { %6771 = vst [vmem:[#allocation211_spill] sm:$0xff] %v5534_v60  ;;  %6772 = vst [vmem:[#allocation212_spill] sm:$0xff] %v5539_v62  ;;  %v5544_v44 = vld [vmem:[%s6564_s9 + $0x590] sm:$0xff]  ;;  %v5549_v63 = vld [vmem:[%s6564_s9 + $0x598] sm:$0xff] }
  0x75   :  { %6773 = vst [vmem:[#allocation213_spill] sm:$0xff] %v5544_v44  ;;  %6774 = vst [vmem:[#allocation214_spill] sm:$0xff] %v5549_v63  ;;  %v5554_v46 = vld [vmem:[%s6564_s9 + $0x5a0] sm:$0xff]  ;;  %v5559_v60 = vld [vmem:[%s6564_s9 + $0x5a8] sm:$0xff] }
  0x76   :  { %6775 = vst [vmem:[#allocation215_spill] sm:$0xff] %v5554_v46  ;;  %6776 = vst [vmem:[#allocation216_spill] sm:$0xff] %v5559_v60  ;;  %v5564_v62 = vld [vmem:[%s6564_s9 + $0x5b0] sm:$0xff]  ;;  %v5569_v44 = vld [vmem:[%s6564_s9 + $0x5b8] sm:$0xff] }
  0x77   :  { %6777 = vst [vmem:[#allocation217_spill] sm:$0xff] %v5564_v62  ;;  %6778 = vst [vmem:[#allocation218_spill] sm:$0xff] %v5569_v44  ;;  %v5574_v63 = vld [vmem:[%s6564_s9 + $0x5c0] sm:$0xff]  ;;  %v5579_v46 = vld [vmem:[%s6564_s9 + $0x5c8] sm:$0xff] }
  0x78   :  { %6779 = vst [vmem:[#allocation219_spill] sm:$0xff] %v5574_v63  ;;  %6780 = vst [vmem:[#allocation220_spill] sm:$0xff] %v5579_v46  ;;  %v5584_v60 = vld [vmem:[%s6564_s9 + $0x5d0] sm:$0xff]  ;;  %v5589_v62 = vld [vmem:[%s6564_s9 + $0x5d8] sm:$0xff] }
  0x79   :  { %6781 = vst [vmem:[#allocation221_spill] sm:$0xff] %v5584_v60  ;;  %6782 = vst [vmem:[#allocation222_spill] sm:$0xff] %v5589_v62  ;;  %v5594_v44 = vld [vmem:[%s6564_s9 + $0x5e0] sm:$0xff]  ;;  %v5599_v63 = vld [vmem:[%s6564_s9 + $0x5e8] sm:$0xff] }
  0x7a   :  { %6783 = vst [vmem:[#allocation223_spill] sm:$0xff] %v5594_v44  ;;  %6784 = vst [vmem:[#allocation224_spill] sm:$0xff] %v5599_v63  ;;  %v5604_v46 = vld [vmem:[%s6564_s9 + $0x5f0] sm:$0xff]  ;;  %v5609_v60 = vld [vmem:[%s6564_s9 + $0x5f8] sm:$0xff] }
  0x7b   :  { %6785 = vst [vmem:[#allocation225_spill] sm:$0xff] %v5604_v46  ;;  %6786 = vst [vmem:[#allocation226_spill] sm:$0xff] %v5609_v60  ;;  %v5614_v62 = vld [vmem:[%s6564_s9 + $0x600] sm:$0xff]  ;;  %v5619_v44 = vld [vmem:[%s6564_s9 + $0x608] sm:$0xff] }
  0x7c   :  { %6787 = vst [vmem:[#allocation227_spill] sm:$0xff] %v5614_v62  ;;  %6788 = vst [vmem:[#allocation228_spill] sm:$0xff] %v5619_v44  ;;  %v5624_v63 = vld [vmem:[%s6564_s9 + $0x610] sm:$0xff]  ;;  %v5629_v46 = vld [vmem:[%s6564_s9 + $0x618] sm:$0xff] }
  0x7d   :  { %6789 = vst [vmem:[#allocation229_spill] sm:$0xff] %v5624_v63  ;;  %6790 = vst [vmem:[#allocation230_spill] sm:$0xff] %v5629_v46  ;;  %v5634_v60 = vld [vmem:[%s6564_s9 + $0x620] sm:$0xff]  ;;  %v5639_v62 = vld [vmem:[%s6564_s9 + $0x628] sm:$0xff] }
  0x7e   :  { %6791 = vst [vmem:[#allocation231_spill] sm:$0xff] %v5634_v60  ;;  %6792 = vst [vmem:[#allocation232_spill] sm:$0xff] %v5639_v62  ;;  %v5644_v44 = vld [vmem:[%s6564_s9 + $0x630] sm:$0xff]  ;;  %v5649_v63 = vld [vmem:[%s6564_s9 + $0x638] sm:$0xff] }
  0x7f   :  { %6793 = vst [vmem:[#allocation233_spill] sm:$0xff] %v5644_v44  ;;  %6794 = vst [vmem:[#allocation234_spill] sm:$0xff] %v5649_v63  ;;  %v5654_v46 = vld [vmem:[%s6564_s9 + $0x640] sm:$0xff]  ;;  %v5659_v60 = vld [vmem:[%s6564_s9 + $0x648] sm:$0xff] }
  0x80   :  { %6795 = vst [vmem:[#allocation235_spill] sm:$0xff] %v5654_v46  ;;  %6796 = vst [vmem:[#allocation236_spill] sm:$0xff] %v5659_v60  ;;  %v5664_v62 = vld [vmem:[%s6564_s9 + $0x650] sm:$0xff]  ;;  %v5669_v44 = vld [vmem:[%s6564_s9 + $0x658] sm:$0xff] }
  0x81   :  { %6797 = vst [vmem:[#allocation237_spill] sm:$0xff] %v5664_v62  ;;  %6798 = vst [vmem:[#allocation238_spill] sm:$0xff] %v5669_v44  ;;  %v5674_v63 = vld [vmem:[%s6564_s9 + $0x660] sm:$0xff]  ;;  %v5679_v46 = vld [vmem:[%s6564_s9 + $0x668] sm:$0xff] }
  0x82   :  { %6799 = vst [vmem:[#allocation239_spill] sm:$0xff] %v5674_v63  ;;  %6800 = vst [vmem:[#allocation240_spill] sm:$0xff] %v5679_v46  ;;  %v5684_v60 = vld [vmem:[%s6564_s9 + $0x670] sm:$0xff]  ;;  %v5689_v62 = vld [vmem:[%s6564_s9 + $0x678] sm:$0xff] }
  0x83   :  { %6801 = vst [vmem:[#allocation241_spill] sm:$0xff] %v5684_v60  ;;  %6802 = vst [vmem:[#allocation242_spill] sm:$0xff] %v5689_v62  ;;  %v5694_v44 = vld [vmem:[%s6564_s9 + $0x680] sm:$0xff]  ;;  %v5699_v63 = vld [vmem:[%s6564_s9 + $0x688] sm:$0xff] }
  0x84   :  { %6803 = vst [vmem:[#allocation243_spill] sm:$0xff] %v5694_v44  ;;  %6804 = vst [vmem:[#allocation244_spill] sm:$0xff] %v5699_v63  ;;  %v5704_v46 = vld [vmem:[%s6564_s9 + $0x690] sm:$0xff]  ;;  %v5709_v60 = vld [vmem:[%s6564_s9 + $0x698] sm:$0xff] }
  0x85   :  { %6805 = vst [vmem:[#allocation245_spill] sm:$0xff] %v5704_v46  ;;  %6806 = vst [vmem:[#allocation246_spill] sm:$0xff] %v5709_v60  ;;  %v5714_v62 = vld [vmem:[%s6564_s9 + $0x6a0] sm:$0xff]  ;;  %v5719_v44 = vld [vmem:[%s6564_s9 + $0x6a8] sm:$0xff] }
  0x86   :  { %6807 = vst [vmem:[#allocation247_spill] sm:$0xff] %v5714_v62  ;;  %6808 = vst [vmem:[#allocation248_spill] sm:$0xff] %v5719_v44  ;;  %v5724_v63 = vld [vmem:[%s6564_s9 + $0x6b0] sm:$0xff]  ;;  %v5729_v46 = vld [vmem:[%s6564_s9 + $0x6b8] sm:$0xff] }
  0x87   :  { %6809 = vst [vmem:[#allocation249_spill] sm:$0xff] %v5724_v63  ;;  %6810 = vst [vmem:[#allocation250_spill] sm:$0xff] %v5729_v46  ;;  %v5734_v60 = vld [vmem:[%s6564_s9 + $0x6c0] sm:$0xff]  ;;  %v5739_v62 = vld [vmem:[%s6564_s9 + $0x6c8] sm:$0xff] }
  0x88   :  { %6811 = vst [vmem:[#allocation251_spill] sm:$0xff] %v5734_v60  ;;  %6812 = vst [vmem:[#allocation252_spill] sm:$0xff] %v5739_v62  ;;  %v5744_v44 = vld [vmem:[%s6564_s9 + $0x6d0] sm:$0xff]  ;;  %v5749_v63 = vld [vmem:[%s6564_s9 + $0x6d8] sm:$0xff] }
  0x89   :  { %6813 = vst [vmem:[#allocation253_spill] sm:$0xff] %v5744_v44  ;;  %6814 = vst [vmem:[#allocation254_spill] sm:$0xff] %v5749_v63  ;;  %v5754_v46 = vld [vmem:[%s6564_s9 + $0x6e0] sm:$0xff]  ;;  %v5759_v60 = vld [vmem:[%s6564_s9 + $0x6e8] sm:$0xff] }
  0x8a   :  { %6815 = vst [vmem:[#allocation255_spill] sm:$0xff] %v5754_v46  ;;  %6816 = vst [vmem:[#allocation256_spill] sm:$0xff] %v5759_v60  ;;  %v5764_v62 = vld [vmem:[%s6564_s9 + $0x6f0] sm:$0xff]  ;;  %v5769_v44 = vld [vmem:[%s6564_s9 + $0x6f8] sm:$0xff] }
  0x8b   :  { %6817 = vst [vmem:[#allocation257_spill] sm:$0xff] %v5764_v62  ;;  %6818 = vst [vmem:[#allocation258_spill] sm:$0xff] %v5769_v44  ;;  %v5774_v63 = vld [vmem:[%s6564_s9 + $0x700] sm:$0xff]  ;;  %v5779_v46 = vld [vmem:[%s6564_s9 + $0x708] sm:$0xff] }
  0x8c   :  { %6819 = vst [vmem:[#allocation259_spill] sm:$0xff] %v5774_v63  ;;  %6820 = vst [vmem:[#allocation260_spill] sm:$0xff] %v5779_v46  ;;  %v5784_v60 = vld [vmem:[%s6564_s9 + $0x710] sm:$0xff]  ;;  %v5789_v62 = vld [vmem:[%s6564_s9 + $0x718] sm:$0xff] }
  0x8d   :  { %6821 = vst [vmem:[#allocation261_spill] sm:$0xff] %v5784_v60  ;;  %6822 = vst [vmem:[#allocation262_spill] sm:$0xff] %v5789_v62  ;;  %v5794_v44 = vld [vmem:[%s6564_s9 + $0x720] sm:$0xff]  ;;  %v5799_v63 = vld [vmem:[%s6564_s9 + $0x728] sm:$0xff] }
  0x8e   :  { %6823 = vst [vmem:[#allocation263_spill] sm:$0xff] %v5794_v44  ;;  %6824 = vst [vmem:[#allocation264_spill] sm:$0xff] %v5799_v63  ;;  %v5804_v46 = vld [vmem:[%s6564_s9 + $0x730] sm:$0xff]  ;;  %v5809_v60 = vld [vmem:[%s6564_s9 + $0x738] sm:$0xff] }
  0x8f   :  { %6825 = vst [vmem:[#allocation265_spill] sm:$0xff] %v5804_v46  ;;  %6826 = vst [vmem:[#allocation266_spill] sm:$0xff] %v5809_v60  ;;  %v5814_v62 = vld [vmem:[%s6564_s9 + $0x740] sm:$0xff]  ;;  %v5819_v44 = vld [vmem:[%s6564_s9 + $0x748] sm:$0xff] }
  0x90   :  { %6827 = vst [vmem:[#allocation267_spill] sm:$0xff] %v5814_v62  ;;  %6828 = vst [vmem:[#allocation268_spill] sm:$0xff] %v5819_v44  ;;  %v5824_v63 = vld [vmem:[%s6564_s9 + $0x750] sm:$0xff]  ;;  %v5829_v46 = vld [vmem:[%s6564_s9 + $0x758] sm:$0xff] }
  0x91   :  { %6829 = vst [vmem:[#allocation269_spill] sm:$0xff] %v5824_v63  ;;  %6830 = vst [vmem:[#allocation270_spill] sm:$0xff] %v5829_v46  ;;  %v5834_v60 = vld [vmem:[%s6564_s9 + $0x760] sm:$0xff]  ;;  %v5839_v62 = vld [vmem:[%s6564_s9 + $0x768] sm:$0xff] }
  0x92   :  { %6831 = vst [vmem:[#allocation271_spill] sm:$0xff] %v5834_v60  ;;  %6832 = vst [vmem:[#allocation272_spill] sm:$0xff] %v5839_v62  ;;  %v5844_v44 = vld [vmem:[%s6564_s9 + $0x770] sm:$0xff]  ;;  %v5849_v63 = vld [vmem:[%s6564_s9 + $0x778] sm:$0xff] }
  0x93   :  { %6833 = vst [vmem:[#allocation273_spill] sm:$0xff] %v5844_v44  ;;  %6834 = vst [vmem:[#allocation274_spill] sm:$0xff] %v5849_v63  ;;  %v5854_v46 = vld [vmem:[%s6564_s9 + $0x780] sm:$0xff]  ;;  %v5859_v60 = vld [vmem:[%s6564_s9 + $0x788] sm:$0xff] }
  0x94   :  { %6835 = vst [vmem:[#allocation275_spill] sm:$0xff] %v5854_v46  ;;  %6836 = vst [vmem:[#allocation276_spill] sm:$0xff] %v5859_v60  ;;  %v5864_v62 = vld [vmem:[%s6564_s9 + $0x790] sm:$0xff]  ;;  %v5869_v44 = vld [vmem:[%s6564_s9 + $0x798] sm:$0xff] }
  0x95   :  { %6837 = vst [vmem:[#allocation277_spill] sm:$0xff] %v5864_v62  ;;  %6838 = vst [vmem:[#allocation278_spill] sm:$0xff] %v5869_v44  ;;  %v5874_v63 = vld [vmem:[%s6564_s9 + $0x7a0] sm:$0xff]  ;;  %v5879_v46 = vld [vmem:[%s6564_s9 + $0x7a8] sm:$0xff] }
  0x96   :  { %6839 = vst [vmem:[#allocation279_spill] sm:$0xff] %v5874_v63  ;;  %6840 = vst [vmem:[#allocation280_spill] sm:$0xff] %v5879_v46  ;;  %v5884_v60 = vld [vmem:[%s6564_s9 + $0x7b0] sm:$0xff]  ;;  %v5889_v62 = vld [vmem:[%s6564_s9 + $0x7b8] sm:$0xff] }
  0x97   :  { %6841 = vst [vmem:[#allocation281_spill] sm:$0xff] %v5884_v60  ;;  %6842 = vst [vmem:[#allocation282_spill] sm:$0xff] %v5889_v62  ;;  %v5894_v44 = vld [vmem:[%s6564_s9 + $0x7c0] sm:$0xff]  ;;  %v5899_v63 = vld [vmem:[%s6564_s9 + $0x7c8] sm:$0xff] }
  0x98   :  { %6843 = vst [vmem:[#allocation283_spill] sm:$0xff] %v5894_v44  ;;  %6844 = vst [vmem:[#allocation284_spill] sm:$0xff] %v5899_v63  ;;  %v5904_v46 = vld [vmem:[%s6564_s9 + $0x7d0] sm:$0xff]  ;;  %v5909_v60 = vld [vmem:[%s6564_s9 + $0x7d8] sm:$0xff] }
  0x99   :  { %6845 = vst [vmem:[#allocation285_spill] sm:$0xff] %v5904_v46  ;;  %6846 = vst [vmem:[#allocation286_spill] sm:$0xff] %v5909_v60  ;;  %v5914_v62 = vld [vmem:[%s6564_s9 + $0x7e0] sm:$0xff]  ;;  %v5919_v44 = vld [vmem:[%s6564_s9 + $0x7e8] sm:$0xff] }
  0x9a   :  { %6847 = vst [vmem:[#allocation287_spill] sm:$0xff] %v5914_v62  ;;  %6848 = vst [vmem:[#allocation288_spill] sm:$0xff] %v5919_v44  ;;  %v5924_v63 = vld [vmem:[%s6564_s9 + $0x7f0] sm:$0xff]  ;;  %v5929_v46 = vld [vmem:[%s6564_s9 + $0x7f8] sm:$0xff] }
  0x9b   :  { %6849 = vst [vmem:[#allocation289_spill] sm:$0xff] %v5924_v63  ;;  %6850 = vst [vmem:[#allocation290_spill] sm:$0xff] %v5929_v46 }
  0x9c   :  { %752 = vsyncadd [#allocation4 + $0x1], 32768  ;;  %v837_v62 = vld [vmem:[%s6557_s2] sm:$0xff]  ;;  %v838_v60 = vld [vmem:[%s6557_s2 + $0x8] sm:$0xff]  ;;  %v6566_v44 = vmov 0.0|0.0   ;;  %vm4270_vm0 = vmmov 0   ;;  %v939_v13 = vlaneseq }
  0x9d   :  { %3834 = vmatprep.subr.bf16.mxu1 %v6566_v44  ;;  %3831 = vmatprep.subr.bf16.mxu0 %v6566_v44  ;;  %v5939_v63 = vpack.c.bf16 %v838_v60, %v837_v62  ;;  %v754_v46 = vld [vmem:[%s6556_s1] sm:$0xff]  ;;  %v755_v47 = vld [vmem:[%s6556_s1 + $0x8] sm:$0xff]  ;;  %v6568_v45 = vmov 0.0   ;;  %v839_v44 = vld [vmem:[%s6557_s2 + $0x10] sm:$0xff]  ;;  %vm763_vm1 = vcmask 130048   ;;  %s4273_s24 = smov 32  }
  0x9e   :  { %v3832_v61 = vpack.c.bf16 %v755_v47, %v754_v46  ;;  %3740 = vmatprep.mubr.msk.f32.mxu0 %vm4270_vm0, %v6568_v45  ;;  %v840_v60 = vld [vmem:[%s6557_s2 + $0x18] sm:$0xff]  ;;  %3751 = vmatprep.mubr.msk.f32.mxu1 %vm4270_vm0, %v6568_v45  ;;  %v6851_v46 = vmov 0.0|0.0   ;;  %v753_v47 = vld [vmem:[%s6555_s0] sm:$0xff]  ;;  %v6001_v58 = vshrl.u32 %v939_v13, 7  ;;  %vm843_vm2 = vcmask 261120  }
  0x9f   :  { %3836 = vmatpush3.bf16.msra.mxu1 %v5939_v63  ;;  %v5958_v62 = vpack.c.bf16 %v840_v60, %v839_v44  ;;  %v3394_v44 = vld [vmem:[%s6558_s3] ss:$0 sm:$0xff]  ;;  %s4272_s3 = smov 64  }
  0xa0   :  { %3833 = vmatpush3.bf16.msra.mxu0 %v3832_v61  ;;  %3837 = vmatprep.subr.bf16.mxu1 %v6851_v46  ;;  %v5989_v28 = vld [vmem:[%s6559_s4] sm:$0x1]  ;;  %6852 = vst [vmem:[#allocation291_spill] sm:$0xff] %v6001_v58 }
  0xa1   :  { %3840 = vmatprep.subr.bf16.mxu0 %v6851_v46  ;;  %v5994_v31 = vld [vmem:[%s6560_s5] sm:$0x1] }
  0xa3   :  { %3741 = vmatmul.mubr.msk.f32.vlgmr.msra.gmra.mrb[0].mxu0 %vm763_vm1, %v753_v47  ;;  %3839 = vmatpush3.bf16.msra.mxu1 %v5958_v62 }
  0xa4   :  { %3842 = vmatpush3.bf16.msra.mxu0 %v5939_v63  ;;  %3762 = vmatprep.mubr.msk.f32.mxu0 %vm4270_vm0, %v6568_v45 }
  0xa5   :  { %3843 = vmatprep.subr.bf16.mxu0 %v6851_v46  ;;  %3846 = vmatprep.subr.bf16.mxu1 %v6851_v46 }
  0xa6   :  { %3752 = vmatmul.mubr.f32.vlgmr.msra.gmra.mrb[0].mxu1 %v6568_v45 }
  0xa7   :  { %3848 = vmatpush3.bf16.msra.mxu1 %v5939_v63  ;;  %3773 = vmatprep.mubr.msk.f32.mxu1 %vm4270_vm0, %v6568_v45 }
  0xa8   :  { %3845 = vmatpush3.bf16.msra.mxu0 %v5958_v62  ;;  %3849 = vmatprep.subr.bf16.mxu1 %v6851_v46 }
  0xa9   :  { %3852 = vmatprep.subr.bf16.mxu0 %v6851_v46 }
  0xab   :  { %3851 = vmatpush3.bf16.msra.mxu1 %v5958_v62 }
  0xac   :  { %3858 = vmatprep.subr.bf16.mxu1 %v6851_v46 }
 0x176   :  { %v833_v61 = vpop.f32.mrb[0].mxu0 }
 0x177   :  { %v5983_v60 = vadd.f32 %v3394_v44, %v833_v61  ;;  %v3742_v47 = vpop.f32.mrb[1].mxu0 }
 0x179   :  { %v913_v30 = vpop.f32.mrb[0].mxu1 }
 0x17a   :  { %v917_v45 = vadd.f32 %v913_v30, %v5983_v60  ;;  %v3753_v14 = vpop.f32.mrb[1].mxu1 }
 0x17c   :  { %4209 = vtanh.f32 %v917_v45 }
 0x186   :  { %v4210_v12 = vpop.eup %4209 }
 0x187   :  { %v919_v44 = vmul.f32 %v4210_v12, %v5989_v28  ;;  %v6004_v12 = vsub.s32 0, %v6001_v58 }
 0x189   :  { %v920_v61 = vadd.f32 %v919_v44, %v5994_v31 }
 0x18b   :  { %923 = vrot.lane.b32.xlu0 %v920_v61, %s4272_s3  ;;  %v921_v45 = vmul.f32 0.0, %v920_v61 }
 0x1fd   :  { %v924_v14 = vpop.permute.xlu0 %923 }
 0x1fe   :  { %v926_v30 = vmul.f32 %v924_v14, %v920_v61 }
 0x200   :  { %928 = vrot.lane.b32.xlu0 %v926_v30, %s4273_s24 }
 0x272   :  { %v929_v47 = vpop.permute.xlu0 %928 }
 0x273   :  { %v931_v15 = vadd.f32 %v929_v47, %v921_v45  ;;  %v6853_v45 = vmov 0.0   ;;  %v4274_v47 = vmov 1966171168  }
 0x275   :  { %4211 = vtanh.f32 %v931_v15 }
 0x27f   :  { %v4212_v29 = vpop.eup %4211 }
 0x280   :  { %934 = vrot.lane.b32.xlu1 %v4212_v29, %s4272_s3 }
 0x2f2   :  { %v935_v44 = vpop.permute.xlu1 %934 }
 0x2f3   :  { %v937_v42 = vmul.f32 %v935_v44, %v920_v61  ;;  %v1024_v44 = vunpack.c.l.s4 %v4274_v47 }
 0x2f5   :  { %v942_v14 = vrot.slane %v937_v42, %v6004_v12 }
 0x2f7   :  { %943 = vrot.lane.b32.xlu1 %v942_v14, %s4273_s24  ;;  %v1025_v14 = vunpack.c.0.s8 %v1024_v44 }
 0x369   :  { %v944_v30 = vpop.permute.xlu1 %943 }
 0x36a   :  { %3763 = vmatmul.mubr.msk.f32.vlgmr.msra.gmra.mrb[2].mxu0 %vm843_vm2, %v944_v30  ;;  %v6017_v30 = vsub.s32 %v1025_v14, %v6001_v58 }
 0x36b   :  { %3854 = vmatpush3.bf16.msra.mxu0 %v5939_v63  ;;  %3784 = vmatprep.mubr.msk.f32.mxu0 %vm4270_vm0, %v6853_v45 }
 0x36c   :  { %3855 = vmatprep.subr.bf16.mxu0 %v6851_v46 }
 0x36f   :  { %3857 = vmatpush3.bf16.msra.mxu0 %v5958_v62 }
 0x370   :  { %3864 = vmatprep.subr.bf16.mxu0 %v6851_v46 }
 0x43d   :  { %v1013_v13 = vpop.f32.mrb[2].mxu0 }
 0x43e   :  { %v1018_v29 = vrot.slane %v1013_v13, 7  ;;  %v3764_v42 = vpop.f32.mrb[3].mxu0 }
 0x440   :  { %v1020_v61 = vadd.f32 %v1018_v29, %v5983_v60 }
 0x442   :  { %4213 = vtanh.f32 %v1020_v61 }
 0x44c   :  { %v4214_v56 = vpop.eup %4213 }
 0x44d   :  { %v1029_v40 = vrot.slane %v4214_v56, %v6017_v30 }
 0x44f   :  { %v1030_v59 = vcombine.high %v1029_v40, %v1029_v40 }
 0x451   :  { %v1037_v43 = vrot.slane %v1030_v59, %v6017_v30 }
 0x453   :  { %v1039_v57 = vmul.f32 %v1037_v43, %v5989_v28 }
 0x455   :  { %v1040_v13 = vadd.f32 %v1039_v57, %v5994_v31 }
 0x457   :  { %1043 = vrot.lane.b32.xlu0 %v1040_v13, %s4272_s3  ;;  %v1041_v61 = vmul.f32 %v1040_v13, %v931_v15 }
 0x4c9   :  { %v1044_v29 = vpop.permute.xlu0 %1043 }
 0x4ca   :  { %v1046_v42 = vmul.f32 %v1044_v29, %v1040_v13 }
 0x4cc   :  { %1048 = vrot.lane.b32.xlu1 %v1046_v42, %s4273_s24 }
 0x53e   :  { %v1049_v47 = vpop.permute.xlu1 %1048 }
 0x53f   :  { %v1051_v44 = vadd.f32 %v1049_v47, %v1041_v61 }
 0x541   :  { %4215 = vtanh.f32 %v1051_v44 }
 0x54b   :  { %v4216_v14 = vpop.eup %4215 }
 0x54c   :  { %1054 = vrot.lane.b32.xlu0 %v4216_v14, %s4272_s3 }
 0x5be   :  { %v1055_v40 = vpop.permute.xlu0 %1054 }
 0x5bf   :  { %v1057_v56 = vmul.f32 %v1055_v40, %v1040_v13 }
 0x5c1   :  { %v1062_v59 = vrot.slane %v1057_v56, %v6004_v12 }
 0x5c3   :  { %1063 = vrot.lane.b32.xlu1 %v1062_v59, %s4273_s24 }
 0x635   :  { %v1064_v43 = vpop.permute.xlu1 %1063 }
 0x636   :  { %3774 = vmatmul.mubr.msk.f32.vlgmr.msra.gmra.mrb[2].mxu1 %vm843_vm2, %v1064_v43 }
 0x637   :  { %3860 = vmatpush3.bf16.msra.mxu1 %v5939_v63  ;;  %3795 = vmatprep.mubr.msk.f32.mxu1 %vm4270_vm0, %v6853_v45 }
 0x638   :  { %3861 = vmatprep.subr.bf16.mxu1 %v6851_v46 }
 0x63b   :  { %3863 = vmatpush3.bf16.msra.mxu1 %v5958_v62 }
 0x63c   :  { %3870 = vmatprep.subr.bf16.mxu1 %v6851_v46 }
 0x709   :  { %v1133_v15 = vpop.f32.mrb[2].mxu1 }
 0x70a   :  { %v1138_v57 = vrot.slane %v1133_v15, 6  ;;  %v3775_v13 = vpop.f32.mrb[3].mxu1 }
 0x70c   :  { %v1140_v29 = vadd.f32 %v1138_v57, %v5983_v60 }
 0x70e   :  { %4217 = vtanh.f32 %v1140_v29 }
 0x718   :  { %v4218_v42 = vpop.eup %4217 }
 0x719   :  { %v1149_v61 = vrot.slane %v4218_v42, %v6017_v30 }
 0x71b   :  { %v1156_v47 = vrot.slane %v1149_v61, %v6017_v30 }
 0x71d   :  { %v1157_v14 = vcombine.high %v1156_v47, %v1156_v47 }
 0x71f   :  { %v1159_v40 = vmul.f32 %v1157_v14, %v5989_v28 }
 0x721   :  { %v1160_v56 = vadd.f32 %v1159_v40, %v5994_v31 }
 0x723   :  { %1163 = vrot.lane.b32.xlu0 %v1160_v56, %s4272_s3  ;;  %v1161_v15 = vmul.f32 %v1160_v56, %v1051_v44 }
 0x795   :  { %v1164_v59 = vpop.permute.xlu0 %1163 }
 0x796   :  { %v1166_v43 = vmul.f32 %v1164_v59, %v1160_v56 }
 0x798   :  { %1168 = vrot.lane.b32.xlu1 %v1166_v43, %s4273_s24 }
 0x80a   :  { %v1169_v13 = vpop.permute.xlu1 %1168 }
 0x80b   :  { %v1171_v57 = vadd.f32 %v1169_v13, %v1161_v15 }
 0x80d   :  { %4219 = vtanh.f32 %v1171_v57 }
 0x817   :  { %v4220_v29 = vpop.eup %4219 }
 0x818   :  { %1174 = vrot.lane.b32.xlu0 %v4220_v29, %s4272_s3 }
 0x88a   :  { %v1175_v42 = vpop.permute.xlu0 %1174 }
 0x88b   :  { %v1177_v61 = vmul.f32 %v1175_v42, %v1160_v56 }
 0x88d   :  { %v1182_v47 = vrot.slane %v1177_v61, %v6004_v12 }
 0x88f   :  { %1183 = vrot.lane.b32.xlu1 %v1182_v47, %s4273_s24 }
 0x901   :  { %v1184_v14 = vpop.permute.xlu1 %1183 }
 0x902   :  { %3785 = vmatmul.mubr.msk.f32.vlgmr.msra.gmra.mrb[4].mxu0 %vm843_vm2, %v1184_v14 }
 0x903   :  { %3866 = vmatpush3.bf16.msra.mxu0 %v5939_v63  ;;  %3806 = vmatprep.mubr.msk.f32.mxu0 %vm4270_vm0, %v6853_v45 }
 0x904   :  { %3867 = vmatprep.subr.bf16.mxu0 %v6851_v46 }
 0x907   :  { %3869 = vmatpush3.bf16.msra.mxu0 %v5958_v62 }
 0x908   :  { %3876 = vmatprep.subr.bf16.mxu0 %v6851_v46 }
 0x9d5   :  { %v1253_v44 = vpop.f32.mrb[4].mxu0 }
 0x9d6   :  { %v1258_v40 = vrot.slane %v1253_v44, 5  ;;  %v3786_v56 = vpop.f32.mrb[5].mxu0 }
 0x9d8   :  { %v1260_v59 = vadd.f32 %v1258_v40, %v5983_v60 }
 0x9da   :  { %4221 = vtanh.f32 %v1260_v59 }
 0x9e4   :  { %v4222_v43 = vpop.eup %4221 }
 0x9e5   :  { %v1269_v15 = vrot.slane %v4222_v43, %v6017_v30 }
 0x9e7   :  { %v1270_v13 = vcombine.high %v1269_v15, %v1269_v15 }
 0x9e9   :  { %v1277_v29 = vrot.slane %v1270_v13, %v6017_v30 }
 0x9eb   :  { %v1278_v42 = vcombine.high %v1277_v29, %v1277_v29 }
 0x9ed   :  { %v1280_v61 = vmul.f32 %v1278_v42, %v5989_v28 }
 0x9ef   :  { %v1281_v47 = vadd.f32 %v1280_v61, %v5994_v31 }
 0x9f1   :  { %1284 = vrot.lane.b32.xlu0 %v1281_v47, %s4272_s3  ;;  %v1282_v44 = vmul.f32 %v1281_v47, %v1171_v57 }
 0xa63   :  { %v1285_v14 = vpop.permute.xlu0 %1284 }
 0xa64   :  { %v1287_v58 = vmul.f32 %v1285_v14, %v1281_v47 }
 0xa66   :  { %1289 = vrot.lane.b32.xlu1 %v1287_v58, %s4273_s24 }
 0xad8   :  { %v1290_v40 = vpop.permute.xlu1 %1289 }
 0xad9   :  { %v1292_v56 = vadd.f32 %v1290_v40, %v1282_v44 }
 0xadb   :  { %4223 = vtanh.f32 %v1292_v56 }
 0xae5   :  { %v4224_v59 = vpop.eup %4223 }
 0xae6   :  { %1295 = vrot.lane.b32.xlu0 %v4224_v59, %s4272_s3 }
 0xb58   :  { %v1296_v43 = vpop.permute.xlu0 %1295 }
 0xb59   :  { %v1298_v15 = vmul.f32 %v1296_v43, %v1281_v47 }
 0xb5b   :  { %v1303_v13 = vrot.slane %v1298_v15, %v6004_v12 }
 0xb5d   :  { %1304 = vrot.lane.b32.xlu1 %v1303_v13, %s4273_s24 }
 0xbcf   :  { %v1305_v29 = vpop.permute.xlu1 %1304 }
 0xbd0   :  { %3796 = vmatmul.mubr.msk.f32.vlgmr.msra.gmra.mrb[4].mxu1 %vm843_vm2, %v1305_v29 }
 0xbd1   :  { %3872 = vmatpush3.bf16.msra.mxu1 %v5939_v63  ;;  %3817 = vmatprep.mubr.msk.f32.mxu1 %vm4270_vm0, %v6853_v45 }
 0xbd2   :  { %3873 = vmatprep.subr.bf16.mxu1 %v6851_v46 }
 0xbd5   :  { %3875 = vmatpush3.bf16.msra.mxu1 %v5958_v62 }
 0xca3   :  { %v1374_v58 = vpop.f32.mrb[4].mxu1 }
 0xca4   :  { %v1379_v57 = vrot.slane %v1374_v58, 4  ;;  %v3797_v42 = vpop.f32.mrb[5].mxu1 }
 0xca6   :  { %v1381_v61 = vadd.f32 %v1379_v57, %v5983_v60 }
 0xca8   :  { %4225 = vtanh.f32 %v1381_v61 }
 0xcb2   :  { %v4226_v47 = vpop.eup %4225 }
 0xcb3   :  { %v1384_v14 = vcombine.high %v4226_v47, %v4226_v47 }
 0xcb5   :  { %v1391_v44 = vrot.slane %v1384_v14, %v6017_v30 }
 0xcb7   :  { %v1398_v40 = vrot.slane %v1391_v44, %v6017_v30 }
 0xcb9   :  { %v1400_v59 = vmul.f32 %v1398_v40, %v5989_v28 }
 0xcbb   :  { %v1401_v43 = vadd.f32 %v1400_v59, %v5994_v31 }
 0xcbd   :  { %1404 = vrot.lane.b32.xlu0 %v1401_v43, %s4272_s3  ;;  %v1402_v29 = vmul.f32 %v1401_v43, %v1292_v56 }
 0xd2f   :  { %v1405_v15 = vpop.permute.xlu0 %1404 }
 0xd30   :  { %v1407_v13 = vmul.f32 %v1405_v15, %v1401_v43 }
 0xd32   :  { %1409 = vrot.lane.b32.xlu1 %v1407_v13, %s4273_s24 }
 0xda4   :  { %v1410_v58 = vpop.permute.xlu1 %1409 }
 0xda5   :  { %v1412_v57 = vadd.f32 %v1410_v58, %v1402_v29 }
 0xda7   :  { %4227 = vtanh.f32 %v1412_v57 }
 0xdb1   :  { %v4228_v42 = vpop.eup %4227 }
 0xdb2   :  { %1415 = vrot.lane.b32.xlu0 %v4228_v42, %s4272_s3 }
 0xe24   :  { %v1416_v61 = vpop.permute.xlu0 %1415 }
 0xe25   :  { %v1418_v47 = vmul.f32 %v1416_v61, %v1401_v43 }
 0xe27   :  { %v1423_v14 = vrot.slane %v1418_v47, %v6004_v12 }
 0xe29   :  { %1424 = vrot.lane.b32.xlu1 %v1423_v14, %s4273_s24 }
 0xe9b   :  { %v1425_v44 = vpop.permute.xlu1 %1424 }
 0xe9c   :  { %3807 = vmatmul.mubr.msk.f32.vlgmr.msra.gmra.mrb[6].mxu0 %vm843_vm2, %v1425_v44 }
 0xe9d   :  { %3878 = vmatpush3.bf16.msra.mxu0 %v5939_v63  ;;  %3828 = vmatprep.mubr.msk.f32.mxu0 %vm4270_vm0, %v6853_v45 }
 0xe9e   :  { %3879 = vmatprep.subr.bf16.mxu0 %v6851_v46 }
 0xea1   :  { %3881 = vmatpush3.bf16.msra.mxu0 %v5958_v62 }
 0xf6f   :  { %v1494_v56 = vpop.f32.mrb[6].mxu0 }
 0xf70   :  { %v1499_v40 = vrot.slane %v1494_v56, 3  ;;  %v3808_v59 = vpop.f32.mrb[7].mxu0 }
 0xf72   :  { %v1501_v43 = vadd.f32 %v1499_v40, %v5983_v60 }
 0xf74   :  { %4229 = vtanh.f32 %v1501_v43 }
 0xf7e   :  { %v4230_v15 = vpop.eup %4229 }
 0xf7f   :  { %v1504_v13 = vcombine.high %v4230_v15, %v4230_v15 }
 0xf81   :  { %v1511_v29 = vrot.slane %v1504_v13, %v6017_v30 }
 0xf83   :  { %v1512_v58 = vcombine.high %v1511_v29, %v1511_v29 }
 0xf85   :  { %v1519_v63 = vrot.slane %v1512_v58, %v6017_v30 }
 0xf87   :  { %v1521_v42 = vmul.f32 %v1519_v63, %v5989_v28 }
 0xf89   :  { %v1522_v61 = vadd.f32 %v1521_v42, %v5994_v31 }
 0xf8b   :  { %1525 = vrot.lane.b32.xlu0 %v1522_v61, %s4272_s3  ;;  %v1523_v47 = vmul.f32 %v1522_v61, %v1412_v57 }
 0xffd   :  { %v1526_v62 = vpop.permute.xlu0 %1525 }
 0xffe   :  { %v1528_v46 = vmul.f32 %v1526_v62, %v1522_v61 }
0x1000   :  { %1530 = vrot.lane.b32.xlu1 %v1528_v46, %s4273_s24 }
0x1072   :  { %v1531_v14 = vpop.permute.xlu1 %1530 }
0x1073   :  { %v1533_v44 = vadd.f32 %v1531_v14, %v1523_v47 }
0x1075   :  { %4231 = vtanh.f32 %v1533_v44 }
0x107f   :  { %v4232_v56 = vpop.eup %4231 }
0x1080   :  { %1536 = vrot.lane.b32.xlu0 %v4232_v56, %s4272_s3 }
0x10f2   :  { %v1537_v40 = vpop.permute.xlu0 %1536 }
0x10f3   :  { %v1539_v59 = vmul.f32 %v1537_v40, %v1522_v61 }
0x10f5   :  { %v1544_v43 = vrot.slane %v1539_v59, %v6004_v12 }
0x10f7   :  { %1545 = vrot.lane.b32.xlu1 %v1544_v43, %s4273_s24 }
0x1169   :  { %v1546_v15 = vpop.permute.xlu1 %1545 }
0x116a   :  { %3818 = vmatmul.mubr.msk.f32.vlgmr.msra.gmra.mrb[6].mxu1 %vm843_vm2, %v1546_v15 }
0x116b   :  { %2009 = vmatprep.mubr.f32.mxu1 %v6853_v45 }
0x123d   :  { %v1615_v13 = vpop.f32.mrb[6].mxu1 }
0x123e   :  { %v1620_v29 = vrot.slane %v1615_v13, 2  ;;  %v3819_v58 = vpop.f32.mrb[7].mxu1 }
0x1240   :  { %v1622_v57 = vadd.f32 %v1620_v29, %v5983_v60 }
0x1242   :  { %4233 = vtanh.f32 %v1622_v57 }
0x124c   :  { %v4234_v63 = vpop.eup %4233 }
0x124d   :  { %v1625_v42 = vcombine.high %v4234_v63, %v4234_v63 }
0x124f   :  { %v1632_v62 = vrot.slane %v1625_v42, %v6017_v30 }
0x1251   :  { %v1639_v46 = vrot.slane %v1632_v62, %v6017_v30 }
0x1253   :  { %v1640_v61 = vcombine.high %v1639_v46, %v1639_v46 }
0x1255   :  { %v1642_v47 = vmul.f32 %v1640_v61, %v5989_v28 }
0x1257   :  { %v1643_v14 = vadd.f32 %v1642_v47, %v5994_v31 }
0x1259   :  { %1646 = vrot.lane.b32.xlu0 %v1643_v14, %s4272_s3  ;;  %v1644_v59 = vmul.f32 %v1643_v14, %v1533_v44 }
0x12cb   :  { %v1647_v56 = vpop.permute.xlu0 %1646 }
0x12cc   :  { %v1649_v40 = vmul.f32 %v1647_v56, %v1643_v14 }
0x12ce   :  { %1651 = vrot.lane.b32.xlu1 %v1649_v40, %s4273_s24 }
0x1340   :  { %v1652_v43 = vpop.permute.xlu1 %1651 }
0x1341   :  { %v1654_v15 = vadd.f32 %v1652_v43, %v1644_v59 }
0x1343   :  { %4235 = vtanh.f32 %v1654_v15 }
0x134d   :  { %v4236_v13 = vpop.eup %4235 }
0x134e   :  { %1657 = vrot.lane.b32.xlu0 %v4236_v13, %s4272_s3 }
0x13c0   :  { %v1658_v29 = vpop.permute.xlu0 %1657 }
0x13c1   :  { %v1660_v58 = vmul.f32 %v1658_v29, %v1643_v14 }
0x13c3   :  { %v1665_v57 = vrot.slane %v1660_v58, %v6004_v12 }
0x13c5   :  { %1666 = vrot.lane.b32.xlu1 %v1665_v57, %s4273_s24 }
0x1437   :  { %v1667_v63 = vpop.permute.xlu1 %1666 }
0x1438   :  { %3829 = vmatmul.mubr.msk.f32.vlgmr.msra.gmra.mrb[8].mxu0 %vm843_vm2, %v1667_v63 }
0x150b   :  { %v1736_v42 = vpop.f32.mrb[8].mxu0 }
0x150c   :  { %v1741_v62 = vrot.slane %v1736_v42, 1  ;;  %v3830_v46 = vpop.f32.mrb[9].mxu0 }
0x150e   :  { %v1743_v44 = vadd.f32 %v1741_v62, %v5983_v60 }
0x1510   :  { %4237 = vtanh.f32 %v1743_v44  ;;  %v3890_v44 = vpack.c.bf16 %v4429_v19, %v4349_v3 }
0x151a   :  { %v4238_v61 = vpop.eup %4237 }
0x151b   :  { %v1746_v47 = vcombine.high %v4238_v61, %v4238_v61 }
0x151d   :  { %v1753_v56 = vrot.slane %v1746_v47, %v6017_v30 }
0x151f   :  { %v1754_v40 = vcombine.high %v1753_v56, %v1753_v56 }
0x1521   :  { %v1761_v14 = vrot.slane %v1754_v40, %v6017_v30 }
0x1523   :  { %v1762_v59 = vcombine.high %v1761_v14, %v1761_v14 }
0x1525   :  { %v1764_v43 = vmul.f32 %v1762_v59, %v5989_v28 }
0x1527   :  { %v1765_v13 = vadd.f32 %v1764_v43, %v5994_v31  ;;  %v3882_v31 = vpack.c.bf16 %v4419_v17, %v4339_v1 }
0x1529   :  { %1768 = vrot.lane.b32.xlu0 %v1765_v13, %s4272_s3  ;;  %v1766_v60 = vmul.f32 %v1765_v13, %v1654_v15  ;;  %v3884_v15 = vpack.c.bf16 %v4414_v16, %v4334_v0 }
0x159b   :  { %v1769_v29 = vpop.permute.xlu0 %1768 }
0x159c   :  { %v1771_v58 = vmul.f32 %v1769_v29, %v1765_v13 }
0x159e   :  { %1773 = vrot.lane.b32.xlu1 %v1771_v58, %s4273_s24 }
0x1610   :  { %v1774_v57 = vpop.permute.xlu1 %1773 }
0x1611   :  { %v1776_v63 = vadd.f32 %v1774_v57, %v1766_v60 }
0x1613   :  { %4239 = vtanh.f32 %v1776_v63 }
0x161d   :  { %v4240_v42 = vpop.eup %4239 }
0x161e   :  { %1779 = vrot.lane.b32.xlu0 %v4240_v42, %s4272_s3 }
0x1690   :  { %v1780_v62 = vpop.permute.xlu0 %1779 }
0x1691   :  { %v1782_v30 = vmul.f32 %v1780_v62, %v1765_v13 }
0x1693   :  { %v1783_v46 = vmax.f32 %v1782_v30, 0.0 }
0x1695   :  { %v1858_v28 = vrot.slane %v1783_v46, %v6004_v12 }
0x1696   :  { %4263 = dma.done.wait [#allocation4], 8192 }
0x1697   :  { %4264 = vsyncadd [#allocation4], 4294959104  ;;  %v3892_v61 = vpack.c.bf16 %v4424_v18, %v4344_v2  ;;  %v3886_v47 = vpack.c.bf16 %v4579_v49, %v4499_v33  ;;  %v3894_v56 = vpack.c.bf16 %v4589_v51, %v4509_v35  ;;  %2080 = vmatprep.mubr.f32.mxu0 %v6853_v45  ;;  %1859 = vrot.lane.b32.xlu0 %v1858_v28, %s4273_s24  ;;  %v6858_v33 = vld [vmem:[#allocation27_spill] sm:$0xff]  ;;  %v6862_v35 = vld [vmem:[#allocation17_spill] sm:$0xff] }
0x1698   :  { %3883 = vmatprep.subr.bf16.mxu1 %v3882_v31  ;;  %3891 = vmatprep.subr.bf16.mxu0 %v3890_v44  ;;  %v3888_v0 = vpack.c.bf16 %v4574_v48, %v4494_v32  ;;  %v3896_v1 = vpack.c.bf16 %v4584_v50, %v4504_v34  ;;  %v3898_v2 = vpack.c.bf16 %v4439_v21, %v4359_v5  ;;  %v6856_v32 = vld [vmem:[#allocation30_spill] sm:$0xff]  ;;  %v6860_v34 = vld [vmem:[#allocation29_spill] sm:$0xff]  ;;  %v6866_v48 = vld [vmem:[#allocation16_spill] sm:$0xff] }
0x1699   :  { %3885 = vmatpush1.bf16.msra.mxu1 %v3884_v15  ;;  %3893 = vmatpush1.bf16.msra.mxu0 %v3892_v61  ;;  %v3906_v3 = vpack.c.bf16 %v4449_v23, %v4369_v7  ;;  %v3900_v16 = vpack.c.bf16 %v4434_v20, %v4354_v4  ;;  %v3908_v17 = vpack.c.bf16 %v4444_v22, %v4364_v6  ;;  %v6854_v23 = vld [vmem:[#allocation28_spill] sm:$0xff]  ;;  %v6867_v50 = vld [vmem:[#allocation14_spill] sm:$0xff]  ;;  %v6873_v43 = vld [vmem:[#allocation23_spill] sm:$0xff] }
0x169a   :  { %3887 = vmatprep.subr.bf16.mxu1 %v3886_v47  ;;  %3895 = vmatprep.subr.bf16.mxu0 %v3894_v56  ;;  %v3902_v18 = vpack.c.bf16 %v4599_v53, %v4519_v37  ;;  %v3910_v5 = vpack.c.bf16 %v4609_v55, %v4529_v39  ;;  %v3904_v7 = vpack.c.bf16 %v4594_v52, %v4514_v36  ;;  %v6863_v37 = vld [vmem:[#allocation15_spill] sm:$0xff]  ;;  %v6868_v51 = vld [vmem:[#allocation18_spill] sm:$0xff]  ;;  %v6869_v53 = vld [vmem:[#allocation24_spill] sm:$0xff] }
0x169b   :  { %v3912_v4 = vpack.c.bf16 %v4604_v54, %v4524_v38  ;;  %v3914_v6 = vpack.c.bf16 %v4459_v25, %v4379_v9  ;;  %v3922_v20 = vpack.c.bf16 %v4469_v27, %v4389_v11  ;;  %v3916_v21 = vpack.c.bf16 %v4454_v24, %v4374_v8  ;;  %v6855_v25 = vld [vmem:[#allocation22_spill] sm:$0xff]  ;;  %v6857_v27 = vld [vmem:[#allocation20_spill] sm:$0xff]  ;;  %v6859_v24 = vld [vmem:[#allocation21_spill] sm:$0xff] }
0x169c   :  { %v3924_v22 = vpack.c.bf16 %v4464_v26, %v4384_v10  ;;  %v3918_v9 = vpack.c.bf16 %v6854_v23, %v4539_v41  ;;  %v3926_v11 = vpack.c.bf16 %v6856_v32, %v6855_v25  ;;  %v3920_v8 = vpack.c.bf16 %v6858_v33, %v6857_v27  ;;  %v6861_v26 = vld [vmem:[#allocation13_spill] sm:$0xff]  ;;  %v6864_v38 = vld [vmem:[#allocation19_spill] sm:$0xff]  ;;  %v6865_v41 = vld [vmem:[#allocation12_spill] sm:$0xff] }
0x169d   :  { %3889 = vmatpush1.bf16.msra.mxu1 %v3888_v0  ;;  %3897 = vmatpush1.bf16.msra.mxu0 %v3896_v1  ;;  %v3928_v10 = vpack.c.bf16 %v6860_v34, %v6859_v24  ;;  %v3930_v36 = vpack.c.bf16 %v6862_v35, %v6861_v26  ;;  %v3938_v39 = vpack.c.bf16 %v6864_v38, %v6863_v37  ;;  %v6870_v54 = vld [vmem:[#allocation32_spill] sm:$0xff]  ;;  %v6871_v40 = vld [vmem:[#allocation26_spill] sm:$0xff]  ;;  %v6874_v13 = vld [vmem:[#allocation31_spill] sm:$0xff] }
0x169e   :  { %3899 = vmatprep.subr.bf16.mxu1 %v3898_v2  ;;  %3907 = vmatprep.subr.bf16.mxu0 %v3906_v3  ;;  %v3932_v49 = vpack.c.bf16 %v6866_v48, %v6865_v41  ;;  %v3940_v52 = vpack.c.bf16 %v6868_v51, %v6867_v50  ;;  %v3934_v55 = vpack.c.bf16 %v6870_v54, %v6869_v53  ;;  %v6872_v14 = vld [vmem:[#allocation34_spill] sm:$0xff]  ;;  %v6875_v58 = vld [vmem:[#allocation25_spill] sm:$0xff]  ;;  %v6877_v63 = vld [vmem:[#allocation291_spill] sm:$0xff] }
0x169f   :  { %v3942_v59 = vpack.c.bf16 %v6872_v14, %v6871_v40  ;;  %v3936_v29 = vpack.c.bf16 %v6874_v13, %v6873_v43  ;;  %v6876_v60 = vld [vmem:[#allocation33_spill] sm:$0xff]  ;;  %v1873_v42 = vsub.s32 2, %v6877_v63  ;;  %v1852_v62 = vld [vmem:[%s6561_s6] sm:$0xff]  ;;  %v1869_v30 = vsub.s32 1, %v6877_v63 }
0x16a0   :  { %v3944_v57 = vpack.c.bf16 %v6876_v60, %v6875_v58  ;;  %v1877_v46 = vsub.s32 3, %v6877_v63  ;;  %v1866_v28 = vrot.slane %v1852_v62, %v6004_v12  ;;  %v1881_v2 = vsub.s32 4, %v6877_v63 }
0x16a1   :  { %v1874_v31 = vrot.slane %v1852_v62, %v1873_v42  ;;  %v1889_v3 = vsub.s32 6, %v6877_v63 }
0x16a2   :  { %v1878_v44 = vrot.slane %v1852_v62, %v1877_v46 }
0x1709   :  { %v1860_v19 = vpop.permute.xlu0 %1859 }
0x170a   :  { %3403 = vmatmul.mubr.msk.f32.vlgmr.msra.gmra.mrb[8].mxu1 %vm843_vm2, %v1860_v19  ;;  %3404 = vmatmul.mubr.msk.f32.vlgmr.msra.gmra.mrb[10].mxu0 %vm843_vm2, %v1860_v19 }
0x170b   :  { %3901 = vmatpush1.bf16.msra.mxu1 %v3900_v16  ;;  %3909 = vmatpush1.bf16.msra.mxu0 %v3908_v17 }
0x170c   :  { %3903 = vmatprep.subr.bf16.mxu1 %v3902_v18  ;;  %3911 = vmatprep.subr.bf16.mxu0 %v3910_v5  ;;  %v1885_v18 = vsub.s32 5, %v6877_v63  ;;  %v1893_v5 = vsub.s32 7, %v6877_v63 }
0x170d   :  { %2151 = vmatprep.mubr.f32.mxu1 %v6853_v45  ;;  %2222 = vmatprep.mubr.f32.mxu0 %v6853_v45 }
0x170e   :  { %v1894_v23 = vrot.slane %v1852_v62, %v1893_v5 }
0x170f   :  { %3905 = vmatpush1.bf16.msra.mxu1 %v3904_v7  ;;  %3913 = vmatpush1.bf16.msra.mxu0 %v3912_v4 }
0x1710   :  { %3915 = vmatprep.subr.bf16.mxu1 %v3914_v6  ;;  %3923 = vmatprep.subr.bf16.mxu0 %v3922_v20  ;;  %v1882_v20 = vrot.slane %v1852_v62, %v1881_v2 }
0x1712   :  { %3405 = vmatmul.mubr.msk.f32.vlgmr.msra.gmra.mrb[10].mxu1 %vm843_vm2, %v1860_v19  ;;  %3406 = vmatmul.mubr.msk.f32.vlgmr.msra.gmra.mrb[12].mxu0 %vm843_vm2, %v1860_v19 }
0x1713   :  { %3917 = vmatpush1.bf16.msra.mxu1 %v3916_v21  ;;  %3925 = vmatpush1.bf16.msra.mxu0 %v3924_v22  ;;  %v1890_v21 = vrot.slane %v1852_v62, %v1889_v3  ;;  %v1886_v22 = vrot.slane %v1852_v62, %v1885_v18 }
0x1714   :  { %3919 = vmatprep.subr.bf16.mxu1 %v3918_v9  ;;  %3927 = vmatprep.subr.bf16.mxu0 %v3926_v11 }
0x1715   :  { %2293 = vmatprep.mubr.f32.mxu1 %v6853_v45  ;;  %2364 = vmatprep.mubr.f32.mxu0 %v6853_v45 }
0x1717   :  { %3921 = vmatpush1.bf16.msra.mxu1 %v3920_v8  ;;  %3929 = vmatpush1.bf16.msra.mxu0 %v3928_v10  ;;  %v1853_v8 = vld [vmem:[%s6561_s6 + $0x8] sm:$0xff] }
0x1718   :  { %3931 = vmatprep.subr.bf16.mxu1 %v3930_v36  ;;  %3939 = vmatprep.subr.bf16.mxu0 %v3938_v39  ;;  %v1898_v37 = vrot.slane %v1853_v8, %v6004_v12  ;;  %v1906_v38 = vrot.slane %v1853_v8, %v1873_v42  ;;  %v1902_v39 = vrot.slane %v1853_v8, %v1869_v30 }
0x1719   :  { %v1910_v41 = vrot.slane %v1853_v8, %v1877_v46  ;;  %v1914_v43 = vrot.slane %v1853_v8, %v1881_v2  ;;  %v1922_v13 = vrot.slane %v1853_v8, %v1889_v3  ;;  %v1926_v58 = vrot.slane %v1853_v8, %v1893_v5  ;;  %v6880_v2 = vld [vmem:[#allocation35_spill] sm:$0xff]  ;;  %v6881_v3 = vld [vmem:[#allocation36_spill] sm:$0xff] }
0x171a   :  { %3407 = vmatmul.mubr.msk.f32.vlgmr.msra.gmra.mrb[12].mxu1 %vm843_vm2, %v1860_v19  ;;  %3408 = vmatmul.mubr.msk.f32.vlgmr.msra.gmra.mrb[14].mxu0 %vm843_vm2, %v1860_v19 }
0x171b   :  { %3933 = vmatpush1.bf16.msra.mxu1 %v3932_v49  ;;  %3941 = vmatpush1.bf16.msra.mxu0 %v3940_v52 }
0x171c   :  { %3935 = vmatprep.subr.bf16.mxu1 %v3934_v55  ;;  %3943 = vmatprep.subr.bf16.mxu0 %v3942_v59 }
0x171d   :  { %2435 = vmatprep.mubr.f32.mxu1 %v6853_v45  ;;  %2506 = vmatprep.mubr.f32.mxu0 %v6853_v45  ;;  %v1870_v45 = vrot.slane %v1852_v62, %v1869_v30 }
0x171f   :  { %3937 = vmatpush1.bf16.msra.mxu1 %v3936_v29  ;;  %3945 = vmatpush1.bf16.msra.mxu0 %v3944_v57  ;;  %v1918_v29 = vrot.slane %v1853_v8, %v1885_v18  ;;  %v6883_v18 = vld [vmem:[#allocation84_spill] sm:$0xff] }
0x1722   :  { %3409 = vmatmul.mubr.msk.f32.vlgmr.msra.gmra.mrb[14].mxu1 %vm843_vm2, %v1860_v19  ;;  %3410 = vmatmul.mubr.msk.f32.vlgmr.msra.gmra.mrb[16].mxu0 %vm843_vm2, %v1860_v19 }
0x17dd   :  { %v2011_v15 = vpop.f32.mrb[8].mxu1  ;;  %v2082_v61 = vpop.f32.mrb[10].mxu0 }
0x17de   :  { %v6203_v47 = vadd.f32 %v2011_v15, %v1866_v28  ;;  %v6205_v56 = vadd.f32 %v2082_v61, %v1874_v31  ;;  %v2013_v0 = vpop.f32.mrb[9].mxu1  ;;  %v2084_v1 = vpop.f32.mrb[11].mxu0  ;;  %v6878_v61 = vld [vmem:[#allocation51_spill] sm:$0xff] }
0x17df   :  { %v2014_v16 = vadd.f32 %v2013_v0, %v1870_v45  ;;  %v6209_v17 = vadd.f32 %v2084_v1, %v1878_v44  ;;  %v6879_v0 = vld [vmem:[#allocation52_spill] sm:$0xff] }
0x17e0   :  { %v2513_v19 = vmax.f32 %v6203_v47, 0.0  ;;  %v2515_v7 = vmax.f32 %v6205_v56, 0.0  ;;  %v3946_v1 = vpack.c.bf16 %v6879_v0, %v6878_v61 }
0x17e1   :  { %v2514_v4 = vmax.f32 %v2014_v16, 0.0  ;;  %v2516_v6 = vmax.f32 %v6209_v17, 0.0  ;;  %v3948_v16 = vpack.c.bf16 %v6881_v3, %v6880_v2  ;;  %v6882_v17 = vld [vmem:[#allocation83_spill] sm:$0xff] }
0x17e2   :  { %v3978_v5 = vpack.c.bf16 %v6883_v18, %v6882_v17 }
0x17e3   :  { %2853 = vmatprep.mubr.f32.mxu1 %v2514_v4 }
0x17e5   :  { %v2153_v9 = vpop.f32.mrb[10].mxu1  ;;  %v2224_v25 = vpop.f32.mrb[12].mxu0 }
0x17e6   :  { %v6216_v32 = vadd.f32 %v2153_v9, %v1882_v20  ;;  %v6218_v11 = vadd.f32 %v2224_v25, %v1890_v21  ;;  %v2155_v27 = vpop.f32.mrb[11].mxu1  ;;  %v2226_v33 = vpop.f32.mrb[13].mxu0  ;;  %v6884_v20 = vld [vmem:[#allocation67_spill] sm:$0xff]  ;;  %v6885_v21 = vld [vmem:[#allocation68_spill] sm:$0xff] }
0x17e7   :  { %v6223_v24 = vadd.f32 %v2155_v27, %v1886_v22  ;;  %v6225_v34 = vadd.f32 %v2226_v33, %v1894_v23  ;;  %v3980_v22 = vpack.c.bf16 %v6885_v21, %v6884_v20 }
0x17e8   :  { %v2517_v10 = vmax.f32 %v6216_v32, 0.0  ;;  %v2519_v26 = vmax.f32 %v6218_v11, 0.0 }
0x17e9   :  { %v2518_v35 = vmax.f32 %v6223_v24, 0.0  ;;  %v2520_v36 = vmax.f32 %v6225_v34, 0.0 }
0x17ed   :  { %v2295_v48 = vpop.f32.mrb[12].mxu1  ;;  %v2366_v49 = vpop.f32.mrb[14].mxu0 }
0x17ee   :  { %v6232_v50 = vadd.f32 %v2295_v48, %v1898_v37  ;;  %v6234_v51 = vadd.f32 %v2366_v49, %v1906_v38  ;;  %v2297_v52 = vpop.f32.mrb[13].mxu1  ;;  %v2368_v53 = vpop.f32.mrb[15].mxu0 }
0x17ef   :  { %v6236_v54 = vadd.f32 %v2297_v52, %v1902_v39  ;;  %v6238_v55 = vadd.f32 %v2368_v53, %v1910_v41 }
0x17f0   :  { %v2521_v40 = vmax.f32 %v6232_v50, 0.0  ;;  %v2523_v14 = vmax.f32 %v6234_v51, 0.0 }
0x17f1   :  { %v2522_v12 = vmax.f32 %v6236_v54, 0.0  ;;  %v2524_v59 = vmax.f32 %v6238_v55, 0.0 }
0x17f5   :  { %v2437_v60 = vpop.f32.mrb[14].mxu1  ;;  %v2508_v57 = vpop.f32.mrb[16].mxu0 }
0x17f6   :  { %v6244_v63 = vadd.f32 %v2437_v60, %v1914_v43  ;;  %v6246_v42 = vadd.f32 %v2508_v57, %v1922_v13  ;;  %v2439_v62 = vpop.f32.mrb[15].mxu1  ;;  %v2510_v30 = vpop.f32.mrb[17].mxu0 }
0x17f7   :  { %v6248_v46 = vadd.f32 %v2439_v62, %v1918_v29  ;;  %v6250_v28 = vadd.f32 %v2510_v30, %v1926_v58 }
0x17f8   :  { %v2525_v31 = vmax.f32 %v6244_v63, 0.0  ;;  %v2527_v45 = vmax.f32 %v6246_v42, 0.0 }
0x17f9   :  { %v2526_v44 = vmax.f32 %v6248_v46, 0.0  ;;  %v2528_v15 = vmax.f32 %v6250_v28, 0.0 }
0x17fa   :  { %4265 = dma.done.wait [#allocation4 + $0x1], 32768 }
0x17fb   :  { %4266 = vsyncadd [#allocation4 + $0x1], 4294934528  ;;  %v6886_v23 = vld [vmem:[#allocation53_spill] sm:$0xff]  ;;  %v6887_v9 = vld [vmem:[#allocation54_spill] sm:$0xff]  ;;  %2923 = vmatprep.mubr.f32.mxu0 %v2516_v6  ;;  %3947 = vmatprep.subr.bf16.mxu1 %v3946_v1  ;;  %vm3349_vm3 = vcmask 253952  }
0x17fc   :  { %v3950_v25 = vpack.c.bf16 %v6887_v9, %v6886_v23  ;;  %v6888_v27 = vld [vmem:[#allocation85_spill] sm:$0xff]  ;;  %v6889_v33 = vld [vmem:[#allocation86_spill] sm:$0xff]  ;;  %3979 = vmatprep.subr.bf16.mxu0 %v3978_v5  ;;  %3949 = vmatpush3.bf16.msra.mxu1 %v3948_v16  ;;  %v6894_v4 = vld [vmem:[#allocation55_spill] sm:$0xff] }
0x17fd   :  { %v3982_v8 = vpack.c.bf16 %v6889_v33, %v6888_v27  ;;  %3981 = vmatpush3.bf16.msra.mxu0 %v3980_v22  ;;  %v6890_v37 = vld [vmem:[#allocation37_spill] sm:$0xff]  ;;  %v6891_v38 = vld [vmem:[#allocation38_spill] sm:$0xff]  ;;  %v6895_v52 = vld [vmem:[#allocation56_spill] sm:$0xff] }
0x17fe   :  { %v3952_v39 = vpack.c.bf16 %v6891_v38, %v6890_v37  ;;  %v6892_v41 = vld [vmem:[#allocation69_spill] sm:$0xff]  ;;  %v6893_v48 = vld [vmem:[#allocation70_spill] sm:$0xff]  ;;  %3951 = vmatprep.subr.bf16.mxu1 %v3950_v25  ;;  %v3954_v53 = vpack.c.bf16 %v6895_v52, %v6894_v4  ;;  %v6896_v43 = vld [vmem:[#allocation87_spill] sm:$0xff] }
0x17ff   :  { %v3984_v49 = vpack.c.bf16 %v6893_v48, %v6892_v41  ;;  %3983 = vmatprep.subr.bf16.mxu0 %v3982_v8  ;;  %v6897_v13 = vld [vmem:[#allocation88_spill] sm:$0xff]  ;;  %v6898_v6 = vld [vmem:[#allocation39_spill] sm:$0xff]  ;;  %v6902_v61 = vld [vmem:[#allocation57_spill] sm:$0xff] }
0x1800   :  { %v3986_v29 = vpack.c.bf16 %v6897_v13, %v6896_v43  ;;  %3953 = vmatpush3.bf16.msra.mxu1 %v3952_v39  ;;  %v6899_v58 = vld [vmem:[#allocation40_spill] sm:$0xff]  ;;  %v6900_v57 = vld [vmem:[#allocation71_spill] sm:$0xff]  ;;  %v6903_v0 = vld [vmem:[#allocation58_spill] sm:$0xff] }
0x1801   :  { %3985 = vmatpush3.bf16.msra.mxu0 %v3984_v49  ;;  %v3956_v60 = vpack.c.bf16 %v6899_v58, %v6898_v6  ;;  %v6901_v62 = vld [vmem:[#allocation72_spill] sm:$0xff]  ;;  %3955 = vmatprep.subr.bf16.mxu1 %v3954_v53  ;;  %v3958_v1 = vpack.c.bf16 %v6903_v0, %v6902_v61  ;;  %v6904_v2 = vld [vmem:[#allocation89_spill] sm:$0xff]  ;;  %v6905_v3 = vld [vmem:[#allocation90_spill] sm:$0xff] }
0x1802   :  { %v3988_v30 = vpack.c.bf16 %v6901_v62, %v6900_v57  ;;  %3987 = vmatprep.subr.bf16.mxu0 %v3986_v29  ;;  %v3990_v16 = vpack.c.bf16 %v6905_v3, %v6904_v2  ;;  %v6906_v17 = vld [vmem:[#allocation41_spill] sm:$0xff]  ;;  %v6907_v18 = vld [vmem:[#allocation42_spill] sm:$0xff]  ;;  %v6910_v23 = vld [vmem:[#allocation59_spill] sm:$0xff] }
0x1803   :  { %v3960_v5 = vpack.c.bf16 %v6907_v18, %v6906_v17  ;;  %v6908_v20 = vld [vmem:[#allocation73_spill] sm:$0xff]  ;;  %v6909_v21 = vld [vmem:[#allocation74_spill] sm:$0xff]  ;;  %v6911_v9 = vld [vmem:[#allocation60_spill] sm:$0xff] }
0x1804   :  { %3957 = vmatpush3.bf16.msra.mxu1 %v3956_v60  ;;  %v3992_v22 = vpack.c.bf16 %v6909_v21, %v6908_v20  ;;  %v3962_v25 = vpack.c.bf16 %v6911_v9, %v6910_v23  ;;  %v6912_v27 = vld [vmem:[#allocation91_spill] sm:$0xff]  ;;  %v6913_v33 = vld [vmem:[#allocation92_spill] sm:$0xff]  ;;  %v6918_v4 = vld [vmem:[#allocation61_spill] sm:$0xff] }
0x1805   :  { %3989 = vmatpush3.bf16.msra.mxu0 %v3988_v30  ;;  %3959 = vmatprep.subr.bf16.mxu1 %v3958_v1  ;;  %v3994_v8 = vpack.c.bf16 %v6913_v33, %v6912_v27  ;;  %v6914_v37 = vld [vmem:[#allocation43_spill] sm:$0xff]  ;;  %v6915_v38 = vld [vmem:[#allocation44_spill] sm:$0xff]  ;;  %v6919_v52 = vld [vmem:[#allocation62_spill] sm:$0xff] }
0x1806   :  { %3991 = vmatprep.subr.bf16.mxu0 %v3990_v16  ;;  %v3964_v39 = vpack.c.bf16 %v6915_v38, %v6914_v37  ;;  %v6916_v41 = vld [vmem:[#allocation75_spill] sm:$0xff]  ;;  %v6917_v48 = vld [vmem:[#allocation76_spill] sm:$0xff]  ;;  %v3966_v53 = vpack.c.bf16 %v6919_v52, %v6918_v4  ;;  %v6920_v43 = vld [vmem:[#allocation93_spill] sm:$0xff] }
0x1807   :  { %v3996_v49 = vpack.c.bf16 %v6917_v48, %v6916_v41  ;;  %v6921_v13 = vld [vmem:[#allocation94_spill] sm:$0xff]  ;;  %v6922_v6 = vld [vmem:[#allocation45_spill] sm:$0xff]  ;;  %v6926_v61 = vld [vmem:[#allocation63_spill] sm:$0xff] }
0x1808   :  { %3961 = vmatpush3.bf16.msra.mxu1 %v3960_v5  ;;  %v3998_v29 = vpack.c.bf16 %v6921_v13, %v6920_v43  ;;  %v6923_v58 = vld [vmem:[#allocation46_spill] sm:$0xff]  ;;  %v6924_v57 = vld [vmem:[#allocation77_spill] sm:$0xff]  ;;  %v6927_v0 = vld [vmem:[#allocation64_spill] sm:$0xff] }
0x1809   :  { %3993 = vmatpush3.bf16.msra.mxu0 %v3992_v22  ;;  %3963 = vmatprep.subr.bf16.mxu1 %v3962_v25  ;;  %v3968_v60 = vpack.c.bf16 %v6923_v58, %v6922_v6  ;;  %v6925_v62 = vld [vmem:[#allocation78_spill] sm:$0xff]  ;;  %v3970_v1 = vpack.c.bf16 %v6927_v0, %v6926_v61  ;;  %v6928_v2 = vld [vmem:[#allocation95_spill] sm:$0xff]  ;;  %v6929_v3 = vld [vmem:[#allocation96_spill] sm:$0xff] }
0x180a   :  { %3995 = vmatprep.subr.bf16.mxu0 %v3994_v8  ;;  %v4000_v30 = vpack.c.bf16 %v6925_v62, %v6924_v57  ;;  %v4002_v16 = vpack.c.bf16 %v6929_v3, %v6928_v2  ;;  %v6930_v17 = vld [vmem:[#allocation47_spill] sm:$0xff]  ;;  %v6931_v18 = vld [vmem:[#allocation48_spill] sm:$0xff]  ;;  %v6934_v23 = vld [vmem:[#allocation65_spill] sm:$0xff] }
0x180b   :  { %v3972_v5 = vpack.c.bf16 %v6931_v18, %v6930_v17  ;;  %v6932_v20 = vld [vmem:[#allocation79_spill] sm:$0xff]  ;;  %v6933_v21 = vld [vmem:[#allocation80_spill] sm:$0xff]  ;;  %v6935_v9 = vld [vmem:[#allocation66_spill] sm:$0xff] }
0x180c   :  { %3965 = vmatpush3.bf16.msra.mxu1 %v3964_v39  ;;  %v4004_v22 = vpack.c.bf16 %v6933_v21, %v6932_v20  ;;  %v3974_v25 = vpack.c.bf16 %v6935_v9, %v6934_v23  ;;  %v6936_v27 = vld [vmem:[#allocation97_spill] sm:$0xff]  ;;  %v6937_v33 = vld [vmem:[#allocation98_spill] sm:$0xff]  ;;  %v6942_v4 = vld [vmem:[#allocation115_spill] sm:$0xff] }
0x180d   :  { %3997 = vmatpush3.bf16.msra.mxu0 %v3996_v49  ;;  %3967 = vmatprep.subr.bf16.mxu1 %v3966_v53  ;;  %v4006_v8 = vpack.c.bf16 %v6937_v33, %v6936_v27  ;;  %v6938_v37 = vld [vmem:[#allocation49_spill] sm:$0xff]  ;;  %v6939_v38 = vld [vmem:[#allocation50_spill] sm:$0xff]  ;;  %v6943_v52 = vld [vmem:[#allocation116_spill] sm:$0xff] }
0x180e   :  { %3999 = vmatprep.subr.bf16.mxu0 %v3998_v29  ;;  %v3976_v39 = vpack.c.bf16 %v6939_v38, %v6938_v37  ;;  %v6940_v41 = vld [vmem:[#allocation81_spill] sm:$0xff]  ;;  %v6941_v48 = vld [vmem:[#allocation82_spill] sm:$0xff]  ;;  %v4010_v53 = vpack.c.bf16 %v6943_v52, %v6942_v4  ;;  %v6944_v43 = vld [vmem:[#allocation147_spill] sm:$0xff] }
0x180f   :  { %v4008_v49 = vpack.c.bf16 %v6941_v48, %v6940_v41  ;;  %v6945_v13 = vld [vmem:[#allocation148_spill] sm:$0xff]  ;;  %v6946_v6 = vld [vmem:[#allocation99_spill] sm:$0xff]  ;;  %v6950_v61 = vld [vmem:[#allocation117_spill] sm:$0xff] }
0x1810   :  { %3969 = vmatpush3.bf16.msra.mxu1 %v3968_v60  ;;  %v4042_v29 = vpack.c.bf16 %v6945_v13, %v6944_v43  ;;  %v6947_v58 = vld [vmem:[#allocation100_spill] sm:$0xff]  ;;  %v6948_v57 = vld [vmem:[#allocation131_spill] sm:$0xff]  ;;  %v6951_v0 = vld [vmem:[#allocation118_spill] sm:$0xff] }
0x1811   :  { %4001 = vmatpush3.bf16.msra.mxu0 %v4000_v30  ;;  %3971 = vmatprep.subr.bf16.mxu1 %v3970_v1  ;;  %v4012_v60 = vpack.c.bf16 %v6947_v58, %v6946_v6  ;;  %v6949_v62 = vld [vmem:[#allocation132_spill] sm:$0xff]  ;;  %v4014_v1 = vpack.c.bf16 %v6951_v0, %v6950_v61  ;;  %v6952_v2 = vld [vmem:[#allocation149_spill] sm:$0xff]  ;;  %v6953_v3 = vld [vmem:[#allocation150_spill] sm:$0xff] }
0x1812   :  { %4003 = vmatprep.subr.bf16.mxu0 %v4002_v16  ;;  %v4044_v30 = vpack.c.bf16 %v6949_v62, %v6948_v57  ;;  %v4046_v16 = vpack.c.bf16 %v6953_v3, %v6952_v2  ;;  %v6954_v17 = vld [vmem:[#allocation101_spill] sm:$0xff]  ;;  %v6955_v18 = vld [vmem:[#allocation102_spill] sm:$0xff]  ;;  %v6958_v23 = vld [vmem:[#allocation119_spill] sm:$0xff] }
0x1813   :  { %v6956_v20 = vld [vmem:[#allocation133_spill] sm:$0xff]  ;;  %v6957_v21 = vld [vmem:[#allocation134_spill] sm:$0xff]  ;;  %v6959_v9 = vld [vmem:[#allocation120_spill] sm:$0xff] }
0x1814   :  { %3973 = vmatpush3.bf16.msra.mxu1 %v3972_v5  ;;  %v4016_v5 = vpack.c.bf16 %v6955_v18, %v6954_v17  ;;  %v6960_v27 = vld [vmem:[#allocation151_spill] sm:$0xff]  ;;  %v6961_v33 = vld [vmem:[#allocation152_spill] sm:$0xff]  ;;  %v6967_v41 = vld [vmem:[#allocation122_spill] sm:$0xff] }
0x1815   :  { %4005 = vmatpush3.bf16.msra.mxu0 %v4004_v22  ;;  %3975 = vmatprep.subr.bf16.mxu1 %v3974_v25  ;;  %v4048_v22 = vpack.c.bf16 %v6957_v21, %v6956_v20  ;;  %v4018_v25 = vpack.c.bf16 %v6959_v9, %v6958_v23  ;;  %v4050_v47 = vpack.c.bf16 %v6961_v33, %v6960_v27  ;;  %v6962_v56 = vld [vmem:[#allocation103_spill] sm:$0xff]  ;;  %v6965_v37 = vld [vmem:[#allocation136_spill] sm:$0xff]  ;;  %v6969_v4 = vld [vmem:[#allocation154_spill] sm:$0xff] }
0x1816   :  { %4007 = vmatprep.subr.bf16.mxu0 %v4006_v8  ;;  %v6964_v8 = vld [vmem:[#allocation135_spill] sm:$0xff]  ;;  %v6970_v34 = vld [vmem:[#allocation105_spill] sm:$0xff] }
0x1817   :  { %v4052_v38 = vpack.c.bf16 %v6965_v37, %v6964_v8  ;;  %v6972_v52 = vld [vmem:[#allocation137_spill] sm:$0xff]  ;;  %v6974_v13 = vld [vmem:[#allocation123_spill] sm:$0xff] }
0x1818   :  { %3977 = vmatpush3.bf16.msra.mxu1 %v3976_v39  ;;  %v6966_v39 = vld [vmem:[#allocation121_spill] sm:$0xff]  ;;  %v6976_v58 = vld [vmem:[#allocation155_spill] sm:$0xff] }
0x1819   :  { %4009 = vmatpush3.bf16.msra.mxu0 %v4008_v49  ;;  %4011 = vmatprep.subr.bf16.mxu1 %v4010_v53  ;;  %v4022_v48 = vpack.c.bf16 %v6967_v41, %v6966_v39  ;;  %v6968_v49 = vld [vmem:[#allocation153_spill] sm:$0xff]  ;;  %v6973_v53 = vld [vmem:[#allocation138_spill] sm:$0xff]  ;;  %v6978_v62 = vld [vmem:[#allocation107_spill] sm:$0xff] }
0x181a   :  { %4043 = vmatprep.subr.bf16.mxu0 %v4042_v29  ;;  %v4054_v24 = vpack.c.bf16 %v6969_v4, %v6968_v49  ;;  %v4056_v43 = vpack.c.bf16 %v6973_v53, %v6972_v52  ;;  %v6975_v29 = vld [vmem:[#allocation124_spill] sm:$0xff]  ;;  %v6980_v0 = vld [vmem:[#allocation139_spill] sm:$0xff]  ;;  %v6982_v3 = vld [vmem:[#allocation125_spill] sm:$0xff] }
0x181b   :  { %2854 = vmatmul.mubr.f32.vlgmr.msra.gmra.mrb[16].mxu1 %v2513_v19  ;;  %v6963_v19 = vld [vmem:[#allocation104_spill] sm:$0xff]  ;;  %v4026_v6 = vpack.c.bf16 %v6975_v29, %v6974_v13  ;;  %v6984_v18 = vld [vmem:[#allocation157_spill] sm:$0xff]  ;;  %v6990_v33 = vld [vmem:[#allocation127_spill] sm:$0xff] }
0x181c   :  { %2924 = vmatmul.mubr.f32.vlgmr.msra.gmra.mrb[18].mxu0 %v2515_v7  ;;  %4013 = vmatpush3.bf16.msra.mxu1 %v4012_v60  ;;  %v4020_v7 = vpack.c.bf16 %v6963_v19, %v6962_v56  ;;  %v6977_v60 = vld [vmem:[#allocation156_spill] sm:$0xff]  ;;  %v6986_v21 = vld [vmem:[#allocation109_spill] sm:$0xff]  ;;  %v6992_v19 = vld [vmem:[#allocation159_spill] sm:$0xff] }
0x181d   :  { %4045 = vmatpush3.bf16.msra.mxu0 %v4044_v30  ;;  %4015 = vmatprep.subr.bf16.mxu1 %v4014_v1  ;;  %v4058_v57 = vpack.c.bf16 %v6977_v60, %v6976_v58  ;;  %v6979_v30 = vld [vmem:[#allocation108_spill] sm:$0xff]  ;;  %v6988_v9 = vld [vmem:[#allocation141_spill] sm:$0xff]  ;;  %v6994_v37 = vld [vmem:[#allocation111_spill] sm:$0xff] }
0x181e   :  { %4047 = vmatprep.subr.bf16.mxu0 %v4046_v16  ;;  %2993 = vmatprep.mubr.f32.mxu1 %v2518_v35  ;;  %v6971_v35 = vld [vmem:[#allocation106_spill] sm:$0xff]  ;;  %v4028_v61 = vpack.c.bf16 %v6979_v30, %v6978_v62  ;;  %v6981_v1 = vld [vmem:[#allocation140_spill] sm:$0xff]  ;;  %v6996_v41 = vld [vmem:[#allocation143_spill] sm:$0xff] }
0x181f   :  { %3063 = vmatprep.mubr.f32.mxu0 %v2520_v36  ;;  %v4024_v36 = vpack.c.bf16 %v6971_v35, %v6970_v34  ;;  %v4060_v2 = vpack.c.bf16 %v6981_v1, %v6980_v0  ;;  %v6983_v16 = vld [vmem:[#allocation126_spill] sm:$0xff]  ;;  %v6998_v4 = vld [vmem:[#allocation129_spill] sm:$0xff]  ;;  %v7006_v60 = vld [vmem:[#allocation179_spill] sm:$0xff] }
0x1820   :  { %4017 = vmatpush3.bf16.msra.mxu1 %v4016_v5  ;;  %v4030_v17 = vpack.c.bf16 %v6983_v16, %v6982_v3  ;;  %v6985_v5 = vld [vmem:[#allocation158_spill] sm:$0xff]  ;;  %v7000_v35 = vld [vmem:[#allocation161_spill] sm:$0xff]  ;;  %v7008_v30 = vld [vmem:[#allocation211_spill] sm:$0xff] }
0x1821   :  { %4049 = vmatpush3.bf16.msra.mxu0 %v4048_v22  ;;  %4019 = vmatprep.subr.bf16.mxu1 %v4018_v25  ;;  %v4062_v20 = vpack.c.bf16 %v6985_v5, %v6984_v18  ;;  %v6987_v22 = vld [vmem:[#allocation110_spill] sm:$0xff]  ;;  %v7002_v53 = vld [vmem:[#allocation113_spill] sm:$0xff]  ;;  %v7010_v1 = vld [vmem:[#allocation163_spill] sm:$0xff] }
0x1822   :  { %4051 = vmatprep.subr.bf16.mxu0 %v4050_v47  ;;  %v4032_v23 = vpack.c.bf16 %v6987_v22, %v6986_v21  ;;  %v6989_v25 = vld [vmem:[#allocation142_spill] sm:$0xff]  ;;  %v6991_v47 = vld [vmem:[#allocation128_spill] sm:$0xff]  ;;  %v7004_v29 = vld [vmem:[#allocation145_spill] sm:$0xff] }
0x1823   :  { %v4064_v27 = vpack.c.bf16 %v6989_v25, %v6988_v9  ;;  %v4034_v56 = vpack.c.bf16 %v6991_v47, %v6990_v33  ;;  %v7012_v16 = vld [vmem:[#allocation195_spill] sm:$0xff]  ;;  %v7014_v5 = vld [vmem:[#allocation181_spill] sm:$0xff] }
0x1824   :  { %4021 = vmatpush3.bf16.msra.mxu1 %v4020_v7  ;;  %v6993_v7 = vld [vmem:[#allocation160_spill] sm:$0xff]  ;;  %v7016_v22 = vld [vmem:[#allocation213_spill] sm:$0xff]  ;;  %v7026_v11 = vld [vmem:[#allocation167_spill] sm:$0xff] }
0x1825   :  { %4053 = vmatpush3.bf16.msra.mxu0 %v4052_v38  ;;  %4023 = vmatprep.subr.bf16.mxu1 %v4022_v48  ;;  %v4066_v8 = vpack.c.bf16 %v6993_v7, %v6992_v19  ;;  %v6995_v38 = vld [vmem:[#allocation112_spill] sm:$0xff]  ;;  %v7018_v25 = vld [vmem:[#allocation165_spill] sm:$0xff]  ;;  %v7022_v7 = vld [vmem:[#allocation183_spill] sm:$0xff] }
0x1826   :  { %4055 = vmatprep.subr.bf16.mxu0 %v4054_v24  ;;  %v4036_v39 = vpack.c.bf16 %v6995_v38, %v6994_v37  ;;  %v6997_v48 = vld [vmem:[#allocation144_spill] sm:$0xff]  ;;  %v6999_v24 = vld [vmem:[#allocation130_spill] sm:$0xff]  ;;  %v7020_v47 = vld [vmem:[#allocation197_spill] sm:$0xff] }
0x1827   :  { %v4068_v49 = vpack.c.bf16 %v6997_v48, %v6996_v41  ;;  %v4038_v34 = vpack.c.bf16 %v6999_v24, %v6998_v4  ;;  %v7024_v38 = vld [vmem:[#allocation215_spill] sm:$0xff]  ;;  %v7029_v48 = vld [vmem:[#allocation200_spill] sm:$0xff]  ;;  %v7030_v4 = vld [vmem:[#allocation185_spill] sm:$0xff] }
0x1828   :  { %4025 = vmatpush3.bf16.msra.mxu1 %v4024_v36  ;;  %v7001_v36 = vld [vmem:[#allocation162_spill] sm:$0xff]  ;;  %v7028_v41 = vld [vmem:[#allocation199_spill] sm:$0xff]  ;;  %v7034_v55 = vld [vmem:[#allocation169_spill] sm:$0xff] }
0x1829   :  { %4057 = vmatpush3.bf16.msra.mxu0 %v4056_v43  ;;  %4027 = vmatprep.subr.bf16.mxu1 %v4026_v6  ;;  %v4070_v52 = vpack.c.bf16 %v7001_v36, %v7000_v35  ;;  %v7003_v43 = vld [vmem:[#allocation114_spill] sm:$0xff]  ;;  %v7032_v35 = vld [vmem:[#allocation217_spill] sm:$0xff]  ;;  %v7090_v51 = vld [vmem:[#allocation231_spill] sm:$0xff] }
0x182a   :  { %4059 = vmatprep.subr.bf16.mxu0 %v4058_v57  ;;  %v4040_v13 = vpack.c.bf16 %v7003_v43, %v7002_v53  ;;  %v7005_v6 = vld [vmem:[#allocation146_spill] sm:$0xff]  ;;  %v7007_v57 = vld [vmem:[#allocation180_spill] sm:$0xff]  ;;  %v7098_v28 = vld [vmem:[#allocation233_spill] sm:$0xff] }
0x182b   :  { %v4072_v58 = vpack.c.bf16 %v7005_v6, %v7004_v29  ;;  %v4074_v62 = vpack.c.bf16 %v7007_v57, %v7006_v60  ;;  %v7031_v24 = vld [vmem:[#allocation186_spill] sm:$0xff]  ;;  %v7039_v29 = vld [vmem:[#allocation188_spill] sm:$0xff] }
0x182c   :  { %4029 = vmatpush3.bf16.msra.mxu1 %v4028_v61  ;;  %v7009_v61 = vld [vmem:[#allocation212_spill] sm:$0xff]  ;;  %v7033_v36 = vld [vmem:[#allocation218_spill] sm:$0xff] }
0x182d   :  { %4061 = vmatpush3.bf16.msra.mxu0 %v4060_v2  ;;  %4031 = vmatprep.subr.bf16.mxu1 %v4030_v17  ;;  %v4106_v0 = vpack.c.bf16 %v7009_v61, %v7008_v30  ;;  %v7011_v2 = vld [vmem:[#allocation164_spill] sm:$0xff]  ;;  %v4118_v54 = vpack.c.bf16 %v7033_v36, %v7032_v35  ;;  %v7037_v53 = vld [vmem:[#allocation202_spill] sm:$0xff] }
0x182e   :  { %4063 = vmatprep.subr.bf16.mxu0 %v4062_v20  ;;  %v4076_v3 = vpack.c.bf16 %v7011_v2, %v7010_v1  ;;  %v7013_v17 = vld [vmem:[#allocation196_spill] sm:$0xff]  ;;  %v7015_v20 = vld [vmem:[#allocation182_spill] sm:$0xff] }
0x182f   :  { %v4108_v18 = vpack.c.bf16 %v7013_v17, %v7012_v16  ;;  %v4078_v21 = vpack.c.bf16 %v7015_v20, %v7014_v5  ;;  %v7041_v60 = vld [vmem:[#allocation220_spill] sm:$0xff]  ;;  %v7047_v16 = vld [vmem:[#allocation190_spill] sm:$0xff] }
0x1830   :  { %4033 = vmatpush3.bf16.msra.mxu1 %v4032_v23  ;;  %v7017_v23 = vld [vmem:[#allocation214_spill] sm:$0xff]  ;;  %v7043_v30 = vld [vmem:[#allocation172_spill] sm:$0xff] }
0x1831   :  { %4065 = vmatpush3.bf16.msra.mxu0 %v4064_v27  ;;  %4035 = vmatprep.subr.bf16.mxu1 %v4034_v56  ;;  %v4110_v9 = vpack.c.bf16 %v7017_v23, %v7016_v22  ;;  %v7019_v27 = vld [vmem:[#allocation166_spill] sm:$0xff]  ;;  %v7045_v1 = vld [vmem:[#allocation204_spill] sm:$0xff] }
0x1832   :  { %4067 = vmatprep.subr.bf16.mxu0 %v4066_v8  ;;  %v4080_v33 = vpack.c.bf16 %v7019_v27, %v7018_v25  ;;  %v7021_v56 = vld [vmem:[#allocation198_spill] sm:$0xff]  ;;  %v7023_v8 = vld [vmem:[#allocation184_spill] sm:$0xff] }
0x1833   :  { %v4112_v19 = vpack.c.bf16 %v7021_v56, %v7020_v47  ;;  %v4082_v37 = vpack.c.bf16 %v7023_v8, %v7022_v7  ;;  %v7049_v5 = vld [vmem:[#allocation222_spill] sm:$0xff]  ;;  %v7055_v47 = vld [vmem:[#allocation192_spill] sm:$0xff] }
0x1834   :  { %4037 = vmatpush3.bf16.msra.mxu1 %v4036_v39  ;;  %v7025_v39 = vld [vmem:[#allocation216_spill] sm:$0xff]  ;;  %v7051_v22 = vld [vmem:[#allocation174_spill] sm:$0xff] }
0x1835   :  { %4069 = vmatpush3.bf16.msra.mxu0 %v4068_v49  ;;  %4039 = vmatprep.subr.bf16.mxu1 %v4038_v34  ;;  %v4114_v32 = vpack.c.bf16 %v7025_v39, %v7024_v38  ;;  %v4116_v49 = vpack.c.bf16 %v7029_v48, %v7028_v41  ;;  %v4086_v34 = vpack.c.bf16 %v7031_v24, %v7030_v4  ;;  %v7053_v25 = vld [vmem:[#allocation206_spill] sm:$0xff]  ;;  %v7057_v7 = vld [vmem:[#allocation224_spill] sm:$0xff] }
0x1836   :  { %4071 = vmatprep.subr.bf16.mxu0 %v4070_v52  ;;  %v7036_v52 = vld [vmem:[#allocation201_spill] sm:$0xff]  ;;  %v7059_v38 = vld [vmem:[#allocation176_spill] sm:$0xff]  ;;  %v7063_v41 = vld [vmem:[#allocation194_spill] sm:$0xff] }
0x1837   :  { %v4120_v43 = vpack.c.bf16 %v7037_v53, %v7036_v52  ;;  %v7065_v4 = vld [vmem:[#allocation226_spill] sm:$0xff]  ;;  %v7071_v52 = vld [vmem:[#allocation244_spill] sm:$0xff] }
0x1838   :  { %4041 = vmatpush3.bf16.msra.mxu1 %v4040_v13  ;;  %v7038_v13 = vld [vmem:[#allocation187_spill] sm:$0xff]  ;;  %v7067_v35 = vld [vmem:[#allocation178_spill] sm:$0xff] }
0x1839   :  { %4073 = vmatpush3.bf16.msra.mxu0 %v4072_v58  ;;  %4075 = vmatprep.subr.bf16.mxu1 %v4074_v62  ;;  %v4090_v6 = vpack.c.bf16 %v7039_v29, %v7038_v13  ;;  %v7040_v58 = vld [vmem:[#allocation219_spill] sm:$0xff]  ;;  %v7073_v13 = vld [vmem:[#allocation276_spill] sm:$0xff] }
0x183a   :  { %4107 = vmatprep.subr.bf16.mxu0 %v4106_v0  ;;  %v4122_v57 = vpack.c.bf16 %v7041_v60, %v7040_v58  ;;  %v7042_v62 = vld [vmem:[#allocation171_spill] sm:$0xff]  ;;  %v7075_v58 = vld [vmem:[#allocation228_spill] sm:$0xff] }
0x183b   :  { %2994 = vmatmul.mubr.f32.vlgmr.msra.gmra.mrb[18].mxu1 %v2517_v10  ;;  %v7027_v10 = vld [vmem:[#allocation168_spill] sm:$0xff]  ;;  %v4092_v61 = vpack.c.bf16 %v7043_v30, %v7042_v62  ;;  %v7044_v0 = vld [vmem:[#allocation203_spill] sm:$0xff] }
0x183c   :  { %3064 = vmatmul.mubr.f32.vlgmr.msra.gmra.mrb[20].mxu0 %v2519_v26  ;;  %4077 = vmatpush3.bf16.msra.mxu1 %v4076_v3  ;;  %v4084_v26 = vpack.c.bf16 %v7027_v10, %v7026_v11  ;;  %v4124_v2 = vpack.c.bf16 %v7045_v1, %v7044_v0  ;;  %v7046_v3 = vld [vmem:[#allocation189_spill] sm:$0xff]  ;;  %v7061_v11 = vld [vmem:[#allocation208_spill] sm:$0xff]  ;;  %v7079_v0 = vld [vmem:[#allocation246_spill] sm:$0xff] }
0x183d   :  { %4109 = vmatpush3.bf16.msra.mxu0 %v4108_v18  ;;  %4079 = vmatprep.subr.bf16.mxu1 %v4078_v21  ;;  %v4094_v17 = vpack.c.bf16 %v7047_v16, %v7046_v3  ;;  %v7048_v18 = vld [vmem:[#allocation221_spill] sm:$0xff]  ;;  %v7077_v62 = vld [vmem:[#allocation260_spill] sm:$0xff]  ;;  %v7081_v3 = vld [vmem:[#allocation278_spill] sm:$0xff] }
0x183e   :  { %4111 = vmatprep.subr.bf16.mxu0 %v4110_v9  ;;  %3133 = vmatprep.mubr.f32.mxu1 %v2522_v12  ;;  %v7035_v12 = vld [vmem:[#allocation170_spill] sm:$0xff]  ;;  %v4126_v20 = vpack.c.bf16 %v7049_v5, %v7048_v18  ;;  %v7050_v21 = vld [vmem:[#allocation173_spill] sm:$0xff] }
0x183f   :  { %3203 = vmatprep.mubr.f32.mxu0 %v2524_v59  ;;  %v4088_v59 = vpack.c.bf16 %v7035_v12, %v7034_v55  ;;  %v4096_v23 = vpack.c.bf16 %v7051_v22, %v7050_v21  ;;  %v7052_v9 = vld [vmem:[#allocation205_spill] sm:$0xff]  ;;  %v7069_v55 = vld [vmem:[#allocation210_spill] sm:$0xff] }
0x1840   :  { %4081 = vmatpush3.bf16.msra.mxu1 %v4080_v33  ;;  %v4128_v27 = vpack.c.bf16 %v7053_v25, %v7052_v9  ;;  %v7054_v33 = vld [vmem:[#allocation191_spill] sm:$0xff]  ;;  %v7083_v18 = vld [vmem:[#allocation230_spill] sm:$0xff]  ;;  %v7087_v9 = vld [vmem:[#allocation248_spill] sm:$0xff] }
0x1841   :  { %4113 = vmatpush3.bf16.msra.mxu0 %v4112_v19  ;;  %4083 = vmatprep.subr.bf16.mxu1 %v4082_v37  ;;  %v4098_v56 = vpack.c.bf16 %v7055_v47, %v7054_v33  ;;  %v7056_v19 = vld [vmem:[#allocation223_spill] sm:$0xff]  ;;  %v7085_v21 = vld [vmem:[#allocation262_spill] sm:$0xff]  ;;  %v7089_v33 = vld [vmem:[#allocation280_spill] sm:$0xff] }
0x1842   :  { %4115 = vmatprep.subr.bf16.mxu0 %v4114_v32  ;;  %v4130_v8 = vpack.c.bf16 %v7057_v7, %v7056_v19  ;;  %v7058_v37 = vld [vmem:[#allocation175_spill] sm:$0xff]  ;;  %v7094_v7 = vld [vmem:[#allocation249_spill] sm:$0xff] }
0x1843   :  { %v4100_v39 = vpack.c.bf16 %v7059_v38, %v7058_v37  ;;  %v7060_v32 = vld [vmem:[#allocation207_spill] sm:$0xff]  ;;  %v7096_v38 = vld [vmem:[#allocation281_spill] sm:$0xff] }
0x1844   :  { %4085 = vmatpush3.bf16.msra.mxu1 %v4084_v26  ;;  %v4132_v10 = vpack.c.bf16 %v7061_v11, %v7060_v32  ;;  %v7062_v26 = vld [vmem:[#allocation193_spill] sm:$0xff]  ;;  %v7092_v47 = vld [vmem:[#allocation263_spill] sm:$0xff]  ;;  %v7101_v11 = vld [vmem:[#allocation266_spill] sm:$0xff] }
0x1845   :  { %4117 = vmatpush3.bf16.msra.mxu0 %v4116_v49  ;;  %4087 = vmatprep.subr.bf16.mxu1 %v4086_v34  ;;  %v4102_v48 = vpack.c.bf16 %v7063_v41, %v7062_v26  ;;  %v7064_v49 = vld [vmem:[#allocation225_spill] sm:$0xff]  ;;  %v7102_v26 = vld [vmem:[#allocation251_spill] sm:$0xff]  ;;  %v7103_v41 = vld [vmem:[#allocation252_spill] sm:$0xff] }
0x1846   :  { %4119 = vmatprep.subr.bf16.mxu0 %v4118_v54  ;;  %v4134_v24 = vpack.c.bf16 %v7065_v4, %v7064_v49  ;;  %v7066_v34 = vld [vmem:[#allocation177_spill] sm:$0xff]  ;;  %v7104_v49 = vld [vmem:[#allocation283_spill] sm:$0xff]  ;;  %v7105_v4 = vld [vmem:[#allocation284_spill] sm:$0xff] }
0x1847   :  { %v4104_v36 = vpack.c.bf16 %v7067_v35, %v7066_v34  ;;  %v7068_v54 = vld [vmem:[#allocation209_spill] sm:$0xff]  ;;  %v7106_v34 = vld [vmem:[#allocation235_spill] sm:$0xff]  ;;  %v7107_v35 = vld [vmem:[#allocation236_spill] sm:$0xff] }
0x1848   :  { %4089 = vmatpush3.bf16.msra.mxu1 %v4088_v59  ;;  %v4136_v12 = vpack.c.bf16 %v7069_v55, %v7068_v54  ;;  %v7070_v59 = vld [vmem:[#allocation243_spill] sm:$0xff]  ;;  %v7100_v32 = vld [vmem:[#allocation265_spill] sm:$0xff]  ;;  %v7109_v55 = vld [vmem:[#allocation268_spill] sm:$0xff] }
0x1849   :  { %4121 = vmatpush3.bf16.msra.mxu0 %v4120_v43  ;;  %4091 = vmatprep.subr.bf16.mxu1 %v4090_v6  ;;  %v4138_v53 = vpack.c.bf16 %v7071_v52, %v7070_v59  ;;  %v7072_v43 = vld [vmem:[#allocation275_spill] sm:$0xff]  ;;  %v7110_v59 = vld [vmem:[#allocation253_spill] sm:$0xff]  ;;  %v7111_v52 = vld [vmem:[#allocation254_spill] sm:$0xff] }
0x184a   :  { %4123 = vmatprep.subr.bf16.mxu0 %v4122_v57  ;;  %v4170_v29 = vpack.c.bf16 %v7073_v13, %v7072_v43  ;;  %v7074_v6 = vld [vmem:[#allocation227_spill] sm:$0xff]  ;;  %v7112_v43 = vld [vmem:[#allocation285_spill] sm:$0xff]  ;;  %v7113_v13 = vld [vmem:[#allocation286_spill] sm:$0xff] }
0x184b   :  { %v4140_v60 = vpack.c.bf16 %v7075_v58, %v7074_v6  ;;  %v7076_v57 = vld [vmem:[#allocation259_spill] sm:$0xff]  ;;  %v7114_v6 = vld [vmem:[#allocation237_spill] sm:$0xff]  ;;  %v7115_v58 = vld [vmem:[#allocation238_spill] sm:$0xff] }
0x184c   :  { %4093 = vmatpush3.bf16.msra.mxu1 %v4092_v61  ;;  %v4172_v30 = vpack.c.bf16 %v7077_v62, %v7076_v57  ;;  %v7078_v61 = vld [vmem:[#allocation245_spill] sm:$0xff]  ;;  %v7108_v54 = vld [vmem:[#allocation267_spill] sm:$0xff]  ;;  %v7117_v62 = vld [vmem:[#allocation270_spill] sm:$0xff] }
0x184d   :  { %4125 = vmatpush3.bf16.msra.mxu0 %v4124_v2  ;;  %4095 = vmatprep.subr.bf16.mxu1 %v4094_v17  ;;  %v4142_v1 = vpack.c.bf16 %v7079_v0, %v7078_v61  ;;  %v7080_v2 = vld [vmem:[#allocation277_spill] sm:$0xff]  ;;  %v7118_v61 = vld [vmem:[#allocation255_spill] sm:$0xff]  ;;  %v7119_v0 = vld [vmem:[#allocation256_spill] sm:$0xff] }
0x184e   :  { %4127 = vmatprep.subr.bf16.mxu0 %v4126_v20  ;;  %v4174_v16 = vpack.c.bf16 %v7081_v3, %v7080_v2  ;;  %v7082_v17 = vld [vmem:[#allocation229_spill] sm:$0xff]  ;;  %v7120_v2 = vld [vmem:[#allocation287_spill] sm:$0xff]  ;;  %v7121_v3 = vld [vmem:[#allocation288_spill] sm:$0xff] }
0x184f   :  { %v4144_v5 = vpack.c.bf16 %v7083_v18, %v7082_v17  ;;  %v7084_v20 = vld [vmem:[#allocation261_spill] sm:$0xff]  ;;  %v7122_v17 = vld [vmem:[#allocation239_spill] sm:$0xff]  ;;  %v7123_v18 = vld [vmem:[#allocation240_spill] sm:$0xff] }
0x1850   :  { %4097 = vmatpush3.bf16.msra.mxu1 %v4096_v23  ;;  %v4176_v22 = vpack.c.bf16 %v7085_v21, %v7084_v20  ;;  %v7086_v23 = vld [vmem:[#allocation247_spill] sm:$0xff]  ;;  %v7116_v57 = vld [vmem:[#allocation269_spill] sm:$0xff]  ;;  %v7125_v21 = vld [vmem:[#allocation272_spill] sm:$0xff] }
0x1851   :  { %4129 = vmatpush3.bf16.msra.mxu0 %v4128_v27  ;;  %4099 = vmatprep.subr.bf16.mxu1 %v4098_v56  ;;  %v4146_v25 = vpack.c.bf16 %v7087_v9, %v7086_v23  ;;  %v7088_v27 = vld [vmem:[#allocation279_spill] sm:$0xff]  ;;  %v7093_v56 = vld [vmem:[#allocation264_spill] sm:$0xff]  ;;  %v7126_v23 = vld [vmem:[#allocation257_spill] sm:$0xff] }
0x1852   :  { %4131 = vmatprep.subr.bf16.mxu0 %v4130_v8  ;;  %v4178_v50 = vpack.c.bf16 %v7089_v33, %v7088_v27  ;;  %v4180_v19 = vpack.c.bf16 %v7093_v56, %v7092_v47  ;;  %v7095_v8 = vld [vmem:[#allocation250_spill] sm:$0xff]  ;;  %v7124_v20 = vld [vmem:[#allocation271_spill] sm:$0xff]  ;;  %v7128_v27 = vld [vmem:[#allocation289_spill] sm:$0xff] }
0x1853   :  { %v4150_v37 = vpack.c.bf16 %v7095_v8, %v7094_v7  ;;  %v7127_v9 = vld [vmem:[#allocation258_spill] sm:$0xff]  ;;  %v7132_v47 = vld [vmem:[#allocation273_spill] sm:$0xff] }
0x1854   :  { %4101 = vmatpush3.bf16.msra.mxu1 %v4100_v39  ;;  %v7097_v39 = vld [vmem:[#allocation282_spill] sm:$0xff] }
0x1855   :  { %4133 = vmatpush3.bf16.msra.mxu0 %v4132_v10  ;;  %4103 = vmatprep.subr.bf16.mxu1 %v4102_v48  ;;  %v4182_v46 = vpack.c.bf16 %v7097_v39, %v7096_v38  ;;  %v4184_v10 = vpack.c.bf16 %v7101_v11, %v7100_v32  ;;  %v4154_v48 = vpack.c.bf16 %v7103_v41, %v7102_v26  ;;  %v7129_v33 = vld [vmem:[#allocation290_spill] sm:$0xff] }
0x1856   :  { %4135 = vmatprep.subr.bf16.mxu0 %v4134_v24  ;;  %v4186_v24 = vpack.c.bf16 %v7105_v4, %v7104_v49  ;;  %v7133_v56 = vld [vmem:[#allocation274_spill] sm:$0xff] }
0x1858   :  { %4105 = vmatpush3.bf16.msra.mxu1 %v4104_v36  ;;  %v4156_v36 = vpack.c.bf16 %v7107_v35, %v7106_v34 }
0x1859   :  { %4137 = vmatpush3.bf16.msra.mxu0 %v4136_v12  ;;  %4139 = vmatprep.subr.bf16.mxu1 %v4138_v53  ;;  %v4188_v12 = vpack.c.bf16 %v7109_v55, %v7108_v54  ;;  %v4158_v53 = vpack.c.bf16 %v7111_v52, %v7110_v59 }
0x185a   :  { %4171 = vmatprep.subr.bf16.mxu0 %v4170_v29  ;;  %v4190_v29 = vpack.c.bf16 %v7113_v13, %v7112_v43 }
0x185b   :  { %3134 = vmatmul.mubr.f32.vlgmr.msra.gmra.mrb[20].mxu1 %v2521_v40  ;;  %v7091_v40 = vld [vmem:[#allocation232_spill] sm:$0xff] }
0x185c   :  { %3204 = vmatmul.mubr.f32.vlgmr.msra.gmra.mrb[22].mxu0 %v2523_v14  ;;  %4141 = vmatpush3.bf16.msra.mxu1 %v4140_v60  ;;  %v4148_v14 = vpack.c.bf16 %v7091_v40, %v7090_v51  ;;  %v4160_v60 = vpack.c.bf16 %v7115_v58, %v7114_v6  ;;  %v7130_v51 = vld [vmem:[#allocation241_spill] sm:$0xff]  ;;  %v7131_v40 = vld [vmem:[#allocation242_spill] sm:$0xff] }
0x185d   :  { %4173 = vmatpush3.bf16.msra.mxu0 %v4172_v30  ;;  %4143 = vmatprep.subr.bf16.mxu1 %v4142_v1  ;;  %v4192_v30 = vpack.c.bf16 %v7117_v62, %v7116_v57  ;;  %v4162_v1 = vpack.c.bf16 %v7119_v0, %v7118_v61 }
0x185e   :  { %4175 = vmatprep.subr.bf16.mxu0 %v4174_v16  ;;  %3273 = vmatprep.mubr.f32.mxu1 %v2526_v44  ;;  %v7099_v44 = vld [vmem:[#allocation234_spill] sm:$0xff]  ;;  %v4194_v16 = vpack.c.bf16 %v7121_v3, %v7120_v2 }
0x185f   :  { %3343 = vmatprep.mubr.f32.mxu0 %v2528_v15  ;;  %v4152_v15 = vpack.c.bf16 %v7099_v44, %v7098_v28 }
0x1860   :  { %4145 = vmatpush3.bf16.msra.mxu1 %v4144_v5  ;;  %v4164_v5 = vpack.c.bf16 %v7123_v18, %v7122_v17 }
0x1861   :  { %4177 = vmatpush3.bf16.msra.mxu0 %v4176_v22  ;;  %4147 = vmatprep.subr.bf16.mxu1 %v4146_v25  ;;  %v4196_v22 = vpack.c.bf16 %v7125_v21, %v7124_v20  ;;  %v4166_v25 = vpack.c.bf16 %v7127_v9, %v7126_v23 }
0x1862   :  { %4179 = vmatprep.subr.bf16.mxu0 %v4178_v50  ;;  %v4198_v50 = vpack.c.bf16 %v7129_v33, %v7128_v27 }
0x1864   :  { %4149 = vmatpush3.bf16.msra.mxu1 %v4148_v14  ;;  %v4168_v14 = vpack.c.bf16 %v7131_v40, %v7130_v51 }
0x1865   :  { %4181 = vmatpush3.bf16.msra.mxu0 %v4180_v19  ;;  %4151 = vmatprep.subr.bf16.mxu1 %v4150_v37  ;;  %v4200_v19 = vpack.c.bf16 %v7133_v56, %v7132_v47  ;;  %v2788_v37 = vld [vmem:[%s6562_s7] sm:$0x1]  ;;  %s4275_s7 = smov [#allocation5]  }
0x1866   :  { %4183 = vmatprep.subr.bf16.mxu0 %v4182_v46  ;;  %s3357_s28 = sshll.u32 %s4275_s7, 4  ;;  %s3358_s28 = int_to_ptr.vmem [resolvable:$true] %s3357_s28 }
0x1867   :  { %s4241_s8 = scalar_lea.vmem %s3358_s28, 16  ;;  %s4245_s29 = scalar_lea.vmem %s3358_s28, 32 }
0x1868   :  { %4153 = vmatpush3.bf16.msra.mxu1 %v4152_v15  ;;  %p4242_p0 = scmp.ne.s32.totalorder %s3358_s28, %s4241_s8  ;;  %p4246_p1 = scmp.lt.s32.totalorder %s3358_s28, %s3358_s28 }
0x1869   :  { %4185 = vmatpush3.bf16.msra.mxu0 %v4184_v10  ;;  %4155 = vmatprep.subr.bf16.mxu1 %v4154_v48  ;;  %p4247_p2 = scmp.lt.s32.totalorder %s4245_s29, %s4241_s8 }
0x186a   :  { %4187 = vmatprep.subr.bf16.mxu0 %v4186_v24 }
0x186b   :  { %p4248_p3 = por %p4247_p2, %p4246_p1 }
0x186c   :  { %4157 = vmatpush3.bf16.msra.mxu1 %v4156_v36 }
0x186d   :  { %4189 = vmatpush3.bf16.msra.mxu0 %v4188_v12  ;;  %4159 = vmatprep.subr.bf16.mxu1 %v4158_v53  ;;  %p4249_p4 = pnand %p4248_p3, %p4242_p0 }
0x186e   :  { %4191 = vmatprep.subr.bf16.mxu0 %v4190_v29 }
0x1870   :  { %4161 = vmatpush3.bf16.msra.mxu1 %v4160_v60 }
0x1871   :  { %4193 = vmatpush3.bf16.msra.mxu0 %v4192_v30  ;;  %4163 = vmatprep.subr.bf16.mxu1 %v4162_v1 }
0x1872   :  { %4195 = vmatprep.subr.bf16.mxu0 %v4194_v16 }
0x1874   :  { %4165 = vmatpush3.bf16.msra.mxu1 %v4164_v5 }
0x1875   :  { %4197 = vmatpush3.bf16.msra.mxu0 %v4196_v22  ;;  %4167 = vmatprep.subr.bf16.mxu1 %v4166_v25 }
0x1876   :  { %4199 = vmatprep.subr.bf16.mxu0 %v4198_v50 }
0x1878   :  { %4169 = vmatpush3.bf16.msra.mxu1 %v4168_v14 }
0x1879   :  { %4201 = vmatpush3.bf16.msra.mxu0 %v4200_v19 }
0x187b   :  { %3274 = vmatmul.mubr.f32.vlgmr.msra.gmra.mrb[22].mxu1 %v2525_v31 }
0x187c   :  { %3344 = vmatmul.mubr.f32.vlgmr.msra.gmra.mrb[24].mxu0 %v2527_v45 }
0x18ee   :  { %v3488_v7 = vpop.f32.mrb[16].mxu1 }
0x18ef   :  { %v3523_v8 = vpop.f32.mrb[18].mxu0  ;;  %v3489_v38 = vpop.f32.mrb[17].mxu1 }
0x18f0   :  { %v3524_v39 = vpop.f32.mrb[19].mxu0  ;;  %v3490_v46 = vadd.f32 %v3489_v38, %v3488_v7 }
0x18f1   :  { %v3525_v28 = vadd.f32 %v3524_v39, %v3523_v8 }
0x18f2   :  { %v2856_v44 = vadd.f32 %v3490_v46, %v2788_v37 }
0x18f4   :  { %v2926_v15 = vadd.f32 %v3525_v28, %v2856_v44 }
0x190e   :  { %v3558_v32 = vpop.f32.mrb[18].mxu1 }
0x190f   :  { %v3593_v11 = vpop.f32.mrb[20].mxu0  ;;  %v3559_v10 = vpop.f32.mrb[19].mxu1 }
0x1910   :  { %v3594_v63 = vpop.f32.mrb[21].mxu0  ;;  %v3560_v31 = vadd.f32 %v3559_v10, %v3558_v32 }
0x1911   :  { %v3595_v26 = vadd.f32 %v3594_v63, %v3593_v11 }
0x1912   :  { %v2996_v42 = vadd.f32 %v3560_v31, %v2926_v15 }
0x1914   :  { %v3066_v45 = vadd.f32 %v3595_v26, %v2996_v42 }
0x192e   :  { %v3628_v41 = vpop.f32.mrb[20].mxu1 }
0x192f   :  { %v3663_v48 = vpop.f32.mrb[22].mxu0  ;;  %v3629_v49 = vpop.f32.mrb[21].mxu1 }
0x1930   :  { %v3664_v4 = vpop.f32.mrb[23].mxu0  ;;  %v3630_v24 = vadd.f32 %v3629_v49, %v3628_v41 }
0x1931   :  { %v3665_v34 = vadd.f32 %v3664_v4, %v3663_v48 }
0x1932   :  { %v3136_v35 = vadd.f32 %v3630_v24, %v3066_v45 }
0x1934   :  { %v3206_v36 = vadd.f32 %v3665_v34, %v3136_v35 }
0x194e   :  { %v3698_v54 = vpop.f32.mrb[22].mxu1 }
0x194f   :  { %v3733_v55 = vpop.f32.mrb[24].mxu0  ;;  %v3699_v12 = vpop.f32.mrb[23].mxu1 }
0x1950   :  { %v3734_v59 = vpop.f32.mrb[25].mxu0  ;;  %v3700_v52 = vadd.f32 %v3699_v12, %v3698_v54 }
0x1951   :  { %v3735_v53 = vadd.f32 %v3734_v59, %v3733_v55 }
0x1952   :  { %v3276_v43 = vadd.f32 %v3700_v52, %v3206_v36 }
0x1954   :  { %v3346_v13 = vadd.f32 %v3735_v53, %v3276_v43 }
0x1956   :  { %3350 = vst.msk [vmem:[#allocation5] sm:$0x1] %vm3349_vm3, %v3346_v13 }
0x1957   :  { %4252 = shalt.err (!%p4249_p4)
}
0x1958   :  { %s4253_s12 = scalar_lea.hbm %s6565_s10, 16 }
0x1959   :  { %p4254_p5 = scmp.ne.s32.totalorder %s6565_s10, %s4253_s12  ;;  %p4257_p6 = scmp.lt.u32.totalorder %s4253_s12, %s6565_s10 }
0x195b   :  { %p4259_p7 = pnand %p4257_p6, %p4254_p5 }
0x195d   :  { %4262 = shalt.err (!%p4259_p7)
}
0x195e   :  { %3360 = dma.vmem_to_hbm [thread:$0]  %s3358_s28, 16, %s6565_s10, [#allocation6]  }
0x195f   :  { %4267 = dma.done.wait [#allocation6], 16  }
0x1960   :  { %4268 = vsyncadd [#allocation6], 4294967280 }
0x1961   :  { %3364 = vsyncpa [#allocation6], 1 }
0x1962   :  { %3365 = vsyncmov [#allocation4] }
0x1965   :  { %s3366_s18 = vpop.sfrf %3365 }
0x1966   :  { %p3411_p8 = scmp.ne.s32.totalorder %s3366_s18, 0 }
0x1968   :  { %3370 = shalt.err (%p3411_p8)  }
0x1969   :  { %3372 = vsyncmov [#allocation4 + $0x1] }
0x196c   :  { %s3373_s1 = vpop.sfrf %3372 }
0x196d   :  { %p3412_p9 = scmp.ne.s32.totalorder %s3373_s1, 0 }
0x196f   :  { %3377 = shalt.err (%p3412_p9)  }

</bundles_post_ra>
